<compile_context>
chip_gen: v7x
topology: tpu7x:2x2x1
jax: 0.10.0
libtpu: 0.0.40
codegen_flags: <defaults>
</compile_context>

<pallas_src>
import math

import jax
import jax.numpy as jnp
from jax.experimental import pallas as pl
from jax.experimental.pallas import tpu as pltpu


def _make_kernel(*, ksize, stride, tile_oh, OW, Wp, C, toc, halo, act):
    m = tile_oh * OW
    kc = ksize * C

    def fattened_lhs(rows, count):
        # rows: (count, Wp, C) -- one input row per output row (H already
        # stride-sampled).  Pack the ksize kw-windows along the contraction
        # axis so a single matmul covers all kw taps of this kh.
        parts = []
        for kw in range(ksize):
            parts.append(jax.lax.slice(
                rows, (0, kw, 0),
                (count, kw + stride * (OW - 1) + 1, C),
                (1, stride, 1)))                              # (count, OW, C)
        lhs = parts[0] if ksize == 1 else jnp.concatenate(parts, axis=-1)
        return lhs.reshape(count * OW, kc)                    # (count*OW, k*C)

    def kernel(*refs):
        if halo > 0:
            a_ref, h_ref, w_ref, scale_ref, shift_ref, o_ref, acc_ref = refs
        else:
            a_ref, w_ref, scale_ref, shift_ref, o_ref, acc_ref = refs
            h_ref = None

        slab = a_ref[0]                                       # (tile_ih, Wp, C)

        for kh in range(ksize):                               # unrolled taps
            n_cross = (kh // stride) if halo > 0 else 0       # rows in halo
            main = tile_oh - n_cross                          # rows in slab

            rows = jax.lax.slice(
                slab, (kh, 0, 0),
                (kh + stride * (main - 1) + 1, Wp, C),
                (stride, 1, 1))                               # (main, Wp, C)
            part = jnp.dot(fattened_lhs(rows, main), w_ref[kh],
                           preferred_element_type=jnp.float32)
            if kh == 0:                                       # n_cross == 0 here
                acc_ref[...] = part
            else:
                acc_ref[0:main * OW, :] += part

            if n_cross > 0:
                # Output rows whose tap row spills into the `halo` rows.
                hrows = jax.lax.slice(
                    h_ref[0], (kh % stride, 0, 0),
                    (kh % stride + stride * (n_cross - 1) + 1, Wp, C),
                    (stride, 1, 1))                           # (n_cross, Wp, C)
                acc_ref[main * OW:, :] += jnp.dot(
                    fattened_lhs(hrows, n_cross), w_ref[kh],
                    preferred_element_type=jnp.float32)

        # BatchNorm (f32 per-channel scale/shift on f32 accumulator) + act.
        y = acc_ref[...] * scale_ref[...] + shift_ref[...]
        if act == "silu":
            y = y * jax.nn.sigmoid(y)                         # sigmoid -> EUP
        elif act == "relu":
            y = jnp.maximum(y, 0.0)
        elif act == "lrelu":
            y = jnp.where(y >= 0.0, y, 0.1 * y)
        else:
            raise ValueError(f"Unsupported act type: {act}")
        o_ref[...] = y.reshape(1, tile_oh, OW, toc).astype(o_ref.dtype)

    return kernel


def base_conv_forward(x_nchw, weight, gamma, beta, running_mean, running_var,
                      *, ksize, stride, eps=1e-5, act="silu", tile_oh=None,
                      target_rows=512, compute_dtype=jnp.bfloat16,
                      vmem_limit_bytes=48 * 1024 * 1024):
    """BaseConv.forward: act(bn(conv(x))); conv has bias=False, groups=1.

    BatchNorm uses running statistics (inference semantics).
    # TODO(synk): train-mode batch statistics and groups>1 are not implemented.
    """
    N, C, H, W = x_nchw.shape
    OC = weight.shape[0]
    pad = (ksize - 1) // 2
    Hp0, Wp = H + 2 * pad, W + 2 * pad
    OH = (Hp0 - ksize) // stride + 1
    OW = (Wp - ksize) // stride + 1

    # Lane-dense output channels, tiled to the MXU width.
    if OC <= 128:
        OCp, toc = 128, 128
    else:
        OCp, toc = pl.cdiv(OC, 256) * 256, 256
    n_oc = OCp // toc

    halo = max(ksize - stride, 0)              # input rows shared w/ next tile

    # Output-row tile: ~target_rows output positions per grid step.
    if tile_oh is None:
        tile_oh = max(1, min(OH, target_rows // max(OW, 1)))
    tile_oh = max(tile_oh, (ksize - 1) // stride + 1)   # cross rows < tile_oh
    if halo > 0:
        q = halo // math.gcd(stride, halo)     # need (stride*tile_oh) % halo == 0
        tile_oh = pl.cdiv(tile_oh, q) * q
    tile_ih = tile_oh * stride
    n_tiles = pl.cdiv(OH, tile_oh)

    # ---- host-side glue (cast first, minimal bottom padding) ----------------
    # TODO(synk): accept/return NHWC at the API to drop these two transposes.
    x = jnp.transpose(x_nchw, (0, 2, 3, 1)).astype(compute_dtype)      # NHWC
    Hpad = max(Hp0, n_tiles * tile_ih + halo)
    x = jnp.pad(x, ((0, 0), (pad, Hpad - H - pad), (pad, pad), (0, 0)))

    # BatchNorm as f32 per-channel scale/shift applied in-kernel.
    inv_std = jax.lax.rsqrt(running_var.astype(jnp.float32) + eps)
    scale = gamma.astype(jnp.float32) * inv_std                        # (OC,)
    shift = beta.astype(jnp.float32) - running_mean.astype(jnp.float32) * scale
    w = jnp.transpose(weight, (2, 3, 1, 0)).astype(compute_dtype)  # (kh,kw,C,OC)
    w = jnp.pad(w, ((0, 0), (0, 0), (0, 0), (0, OCp - OC)))
    w = w.reshape(ksize, ksize * C, OCp)       # (kw, C) packed into contraction
    scale_p = jnp.pad(scale, (0, OCp - OC)).reshape(1, OCp)
    shift_p = jnp.pad(shift, (0, OCp - OC)).reshape(1, OCp)

    kernel = _make_kernel(ksize=ksize, stride=stride, tile_oh=tile_oh, OW=OW,
                          Wp=Wp, C=C, toc=toc, halo=halo, act=act)

    in_specs = [pl.BlockSpec((1, tile_ih, Wp, C),
                             lambda n, oc, i: (n, i, 0, 0))]
    operands = [x]
    if halo > 0:
        hb = tile_ih // halo                   # exact by construction
        in_specs.append(pl.BlockSpec((1, halo, Wp, C),
                                     lambda n, oc, i: (n, (i + 1) * hb, 0, 0)))
        operands.append(x)
    in_specs += [
        pl.BlockSpec((ksize, ksize * C, toc), lambda n, oc, i: (0, 0, oc)),
        pl.BlockSpec((1, toc), lambda n, oc, i: (0, oc)),
        pl.BlockSpec((1, toc), lambda n, oc, i: (0, oc)),
    ]
    operands += [w, scale_p, shift_p]

    out = pl.pallas_call(
        kernel,
        out_shape=jax.ShapeDtypeStruct((N, n_tiles * tile_oh, OW, OCp),
                                       compute_dtype),
        grid_spec=pltpu.PrefetchScalarGridSpec(
            num_scalar_prefetch=0,
            grid=(N, n_oc, n_tiles),
            in_specs=in_specs,
            out_specs=pl.BlockSpec((1, tile_oh, OW, toc),
                                   lambda n, oc, i: (n, i, 0, oc)),
            scratch_shapes=[pltpu.VMEM((tile_oh * OW, toc), jnp.float32)],
        ),
        compiler_params=pltpu.CompilerParams(
            dimension_semantics=("parallel", "parallel", "parallel"),
            vmem_limit_bytes=vmem_limit_bytes),
    )(*operands)

    out = out[:, :OH, :, :OC]
    return jnp.transpose(out, (0, 3, 1, 2)).astype(x_nchw.dtype)   # NCHW


def _reference(x, weight, gamma, beta, mean, var, *, ksize, stride, eps=1e-5):
    pad = (ksize - 1) // 2
    y = jax.lax.conv_general_dilated(
        x, weight, window_strides=(stride, stride),
        padding=[(pad, pad), (pad, pad)],
        dimension_numbers=('NCHW', 'OIHW', 'NCHW'))
    inv = 1.0 / jnp.sqrt(var + eps)
    y = ((y - mean[None, :, None, None]) * (gamma * inv)[None, :, None, None]
         + beta[None, :, None, None])
    return y * jax.nn.sigmoid(y)


if __name__ == "__main__":
    key = jax.random.PRNGKey(0)
    k_x, k_w, k_g, k_b, k_m, k_v = jax.random.split(key, 6)

    # Small shapes consistent with BaseConv(in=4, out=8, ksize=3, stride=1)
    N, C, H, W = 2, 4, 16, 16
    OC, KS, STRIDE = 8, 3, 1

    x = jax.random.normal(k_x, (N, C, H, W), dtype=jnp.float32)
    weight = jax.random.normal(k_w, (OC, C, KS, KS), dtype=jnp.float32) * 0.1
    gamma = 1.0 + 0.1 * jax.random.normal(k_g, (OC,), dtype=jnp.float32)
    beta = 0.1 * jax.random.normal(k_b, (OC,), dtype=jnp.float32)
    running_mean = 0.1 * jax.random.normal(k_m, (OC,), dtype=jnp.float32)
    running_var = jnp.abs(jax.random.normal(k_v, (OC,), dtype=jnp.float32)) + 0.5

    out = base_conv_forward(x, weight, gamma, beta, running_mean, running_var,
                            ksize=KS, stride=STRIDE,
                            compute_dtype=jnp.bfloat16)
    out = jax.block_until_ready(out)

    ref = _reference(x, weight, gamma, beta, running_mean, running_var,
                     ksize=KS, stride=STRIDE)
    assert out.shape == (N, OC, H, W), out.shape
    # bf16 MXU operands / bf16 output store vs the f32 XLA reference.
    err = float(jnp.max(jnp.abs(out - ref)))
    assert jnp.allclose(out, ref, atol=3e-2, rtol=3e-2), err

    print("KERNEL_OK")
</pallas_src>

<mosaic_0001>
module attributes {stable_mosaic.version = 11 : i64} {
  func.func @kernel(%arg0: i32, %arg1: i32, %arg2: i32, %arg3: memref<1x16x18x4xbf16, #tpu.memory_space<vmem>>, %arg4: memref<1x2x18x4xbf16, #tpu.memory_space<vmem>>, %arg5: memref<3x12x128xbf16, #tpu.memory_space<vmem>>, %arg6: memref<1x128xf32, #tpu.memory_space<vmem>>, %arg7: memref<1x128xf32, #tpu.memory_space<vmem>>, %arg8: memref<1x16x16x128xbf16, #tpu.memory_space<vmem>>, %arg9: memref<256x128xf32, #tpu.memory_space<vmem>>) attributes {dimension_semantics = [#tpu.dimension_semantics<parallel>, #tpu.dimension_semantics<parallel>, #tpu.dimension_semantics<parallel>], iteration_bounds = array<i64: 2, 1, 1>, scalar_prefetch = 0 : i64, scratch_operands = 1 : i64, tpu.core_type = #tpu.core_type<tc>, window_params = [{transform_indices = @transform_0, window_bounds = array<i64: 1, 16, 18, 4>}, {transform_indices = @transform_1, window_bounds = array<i64: 1, 2, 18, 4>}, {transform_indices = @transform_2, window_bounds = array<i64: 3, 12, 128>}, {transform_indices = @transform_3, window_bounds = array<i64: 1, 128>}, {transform_indices = @transform_4, window_bounds = array<i64: 1, 128>}, {transform_indices = @transform_5, window_bounds = array<i64: 1, 16, 16, 128>}]} {
    %c0 = arith.constant 0 : index
    %c0_0 = arith.constant 0 : index
    %c0_1 = arith.constant 0 : index
    %c0_2 = arith.constant 0 : index
    %0 = vector.load %arg3[%c0, %c0_0, %c0_1, %c0_2] : memref<1x16x18x4xbf16, #tpu.memory_space<vmem>>, vector<1x16x18x4xbf16>
    %1 = vector.shape_cast %0 : vector<1x16x18x4xbf16> to vector<16x18x4xbf16>
    %2 = vector.extract_strided_slice %1 {offsets = [0, 0, 0], sizes = [16, 18, 4], strides = [1, 1, 1]} : vector<16x18x4xbf16> to vector<16x18x4xbf16>
    %3 = vector.extract_strided_slice %2 {offsets = [0, 0, 0], sizes = [16, 16, 4], strides = [1, 1, 1]} : vector<16x18x4xbf16> to vector<16x16x4xbf16>
    %4 = vector.extract_strided_slice %2 {offsets = [0, 1, 0], sizes = [16, 16, 4], strides = [1, 1, 1]} : vector<16x18x4xbf16> to vector<16x16x4xbf16>
    %5 = vector.extract_strided_slice %2 {offsets = [0, 2, 0], sizes = [16, 16, 4], strides = [1, 1, 1]} : vector<16x18x4xbf16> to vector<16x16x4xbf16>
    %6 = tpu.concatenate %3, %4, %5 in 2 : vector<16x16x4xbf16>, vector<16x16x4xbf16>, vector<16x16x4xbf16> -> vector<16x16x12xbf16>
    %7 = vector.shape_cast %6 : vector<16x16x12xbf16> to vector<256x12xbf16>
    %c0_3 = arith.constant 0 : index
    %c0_4 = arith.constant 0 : index
    %c0_5 = arith.constant 0 : index
    %8 = vector.load %arg5[%c0_3, %c0_4, %c0_5] : memref<3x12x128xbf16, #tpu.memory_space<vmem>>, vector<1x12x128xbf16>
    %9 = vector.shape_cast %8 : vector<1x12x128xbf16> to vector<12x128xbf16>
    %cst = arith.constant dense<0.000000e+00> : vector<256x128xf32>
    %10 = tpu.matmul %7, %9, %cst {dimension_numbers = #tpu.dot_dimension_numbers<[1], [0], [0], [1], [0, 0, 1, 1], [], []>} : vector<256x12xbf16>, vector<12x128xbf16>, vector<256x128xf32> -> vector<256x128xf32>
    %c0_6 = arith.constant 0 : index
    %c0_7 = arith.constant 0 : index
    %11 = vector.load %arg9[%c0_6, %c0_7] : memref<256x128xf32, #tpu.memory_space<vmem>>, vector<256x128xf32>
    tpu.vector_store %arg9[%c0_6, %c0_7], %10 {strides = array<i32>} : memref<256x128xf32, #tpu.memory_space<vmem>>, vector<256x128xf32>,
    %12 = vector.extract_strided_slice %1 {offsets = [1, 0, 0], sizes = [15, 18, 4], strides = [1, 1, 1]} : vector<16x18x4xbf16> to vector<15x18x4xbf16>
    %13 = vector.extract_strided_slice %12 {offsets = [0, 0, 0], sizes = [15, 16, 4], strides = [1, 1, 1]} : vector<15x18x4xbf16> to vector<15x16x4xbf16>
    %14 = vector.extract_strided_slice %12 {offsets = [0, 1, 0], sizes = [15, 16, 4], strides = [1, 1, 1]} : vector<15x18x4xbf16> to vector<15x16x4xbf16>
    %15 = vector.extract_strided_slice %12 {offsets = [0, 2, 0], sizes = [15, 16, 4], strides = [1, 1, 1]} : vector<15x18x4xbf16> to vector<15x16x4xbf16>
    %16 = tpu.concatenate %13, %14, %15 in 2 : vector<15x16x4xbf16>, vector<15x16x4xbf16>, vector<15x16x4xbf16> -> vector<15x16x12xbf16>
    %17 = vector.shape_cast %16 : vector<15x16x12xbf16> to vector<240x12xbf16>
    %c1 = arith.constant 1 : index
    %c0_8 = arith.constant 0 : index
    %c0_9 = arith.constant 0 : index
    %18 = vector.load %arg5[%c1, %c0_8, %c0_9] : memref<3x12x128xbf16, #tpu.memory_space<vmem>>, vector<1x12x128xbf16>
    %19 = vector.shape_cast %18 : vector<1x12x128xbf16> to vector<12x128xbf16>
    %cst_10 = arith.constant dense<0.000000e+00> : vector<240x128xf32>
    %20 = tpu.matmul %17, %19, %cst_10 {dimension_numbers = #tpu.dot_dimension_numbers<[1], [0], [0], [1], [0, 0, 1, 1], [], []>} : vector<240x12xbf16>, vector<12x128xbf16>, vector<240x128xf32> -> vector<240x128xf32>
    %c0_11 = arith.constant 0 : index
    %c0_12 = arith.constant 0 : index
    %21 = vector.load %arg9[%c0_11, %c0_12] : memref<256x128xf32, #tpu.memory_space<vmem>>, vector<240x128xf32>
    %22 = arith.addf %21, %20 : vector<240x128xf32>
    %c0_13 = arith.constant 0 : index
    %c0_14 = arith.constant 0 : index
    %23 = vector.load %arg9[%c0_13, %c0_14] : memref<256x128xf32, #tpu.memory_space<vmem>>, vector<240x128xf32>
    tpu.vector_store %arg9[%c0_13, %c0_14], %22 {strides = array<i32>} : memref<256x128xf32, #tpu.memory_space<vmem>>, vector<240x128xf32>,
    %c0_15 = arith.constant 0 : index
    %c0_16 = arith.constant 0 : index
    %c0_17 = arith.constant 0 : index
    %c0_18 = arith.constant 0 : index
    %24 = vector.load %arg4[%c0_15, %c0_16, %c0_17, %c0_18] : memref<1x2x18x4xbf16, #tpu.memory_space<vmem>>, vector<1x2x18x4xbf16>
    %25 = vector.shape_cast %24 : vector<1x2x18x4xbf16> to vector<2x18x4xbf16>
    %26 = vector.extract_strided_slice %25 {offsets = [0, 0, 0], sizes = [1, 18, 4], strides = [1, 1, 1]} : vector<2x18x4xbf16> to vector<1x18x4xbf16>
    %c240 = arith.constant 240 : index
    %c0_19 = arith.constant 0 : index
    %27 = vector.load %arg9[%c240, %c0_19] : memref<256x128xf32, #tpu.memory_space<vmem>>, vector<16x128xf32>
    %28 = vector.extract_strided_slice %26 {offsets = [0, 0, 0], sizes = [1, 16, 4], strides = [1, 1, 1]} : vector<1x18x4xbf16> to vector<1x16x4xbf16>
    %29 = vector.extract_strided_slice %26 {offsets = [0, 1, 0], sizes = [1, 16, 4], strides = [1, 1, 1]} : vector<1x18x4xbf16> to vector<1x16x4xbf16>
    %30 = vector.extract_strided_slice %26 {offsets = [0, 2, 0], sizes = [1, 16, 4], strides = [1, 1, 1]} : vector<1x18x4xbf16> to vector<1x16x4xbf16>
    %31 = tpu.concatenate %28, %29, %30 in 2 : vector<1x16x4xbf16>, vector<1x16x4xbf16>, vector<1x16x4xbf16> -> vector<1x16x12xbf16>
    %32 = vector.shape_cast %31 : vector<1x16x12xbf16> to vector<16x12xbf16>
    %c1_20 = arith.constant 1 : index
    %c0_21 = arith.constant 0 : index
    %c0_22 = arith.constant 0 : index
    %33 = vector.load %arg5[%c1_20, %c0_21, %c0_22] : memref<3x12x128xbf16, #tpu.memory_space<vmem>>, vector<1x12x128xbf16>
    %34 = vector.shape_cast %33 : vector<1x12x128xbf16> to vector<12x128xbf16>
    %cst_23 = arith.constant dense<0.000000e+00> : vector<16x128xf32>
    %35 = tpu.matmul %32, %34, %cst_23 {dimension_numbers = #tpu.dot_dimension_numbers<[1], [0], [0], [1], [0, 0, 1, 1], [], []>} : vector<16x12xbf16>, vector<12x128xbf16>, vector<16x128xf32> -> vector<16x128xf32>
    %36 = arith.addf %27, %35 : vector<16x128xf32>
    %c240_24 = arith.constant 240 : index
    %c0_25 = arith.constant 0 : index
    %37 = vector.load %arg9[%c240_24, %c0_25] : memref<256x128xf32, #tpu.memory_space<vmem>>, vector<16x128xf32>
    tpu.vector_store %arg9[%c240_24, %c0_25], %36 {strides = array<i32>} : memref<256x128xf32, #tpu.memory_space<vmem>>, vector<16x128xf32>,
    %38 = vector.extract_strided_slice %1 {offsets = [2, 0, 0], sizes = [14, 18, 4], strides = [1, 1, 1]} : vector<16x18x4xbf16> to vector<14x18x4xbf16>
    %39 = vector.extract_strided_slice %38 {offsets = [0, 0, 0], sizes = [14, 16, 4], strides = [1, 1, 1]} : vector<14x18x4xbf16> to vector<14x16x4xbf16>
    %40 = vector.extract_strided_slice %38 {offsets = [0, 1, 0], sizes = [14, 16, 4], strides = [1, 1, 1]} : vector<14x18x4xbf16> to vector<14x16x4xbf16>
    %41 = vector.extract_strided_slice %38 {offsets = [0, 2, 0], sizes = [14, 16, 4], strides = [1, 1, 1]} : vector<14x18x4xbf16> to vector<14x16x4xbf16>
    %42 = tpu.concatenate %39, %40, %41 in 2 : vector<14x16x4xbf16>, vector<14x16x4xbf16>, vector<14x16x4xbf16> -> vector<14x16x12xbf16>
    %43 = vector.shape_cast %42 : vector<14x16x12xbf16> to vector<224x12xbf16>
    %c2 = arith.constant 2 : index
    %c0_26 = arith.constant 0 : index
    %c0_27 = arith.constant 0 : index
    %44 = vector.load %arg5[%c2, %c0_26, %c0_27] : memref<3x12x128xbf16, #tpu.memory_space<vmem>>, vector<1x12x128xbf16>
    %45 = vector.shape_cast %44 : vector<1x12x128xbf16> to vector<12x128xbf16>
    %cst_28 = arith.constant dense<0.000000e+00> : vector<224x128xf32>
    %46 = tpu.matmul %43, %45, %cst_28 {dimension_numbers = #tpu.dot_dimension_numbers<[1], [0], [0], [1], [0, 0, 1, 1], [], []>} : vector<224x12xbf16>, vector<12x128xbf16>, vector<224x128xf32> -> vector<224x128xf32>
    %c0_29 = arith.constant 0 : index
    %c0_30 = arith.constant 0 : index
    %47 = vector.load %arg9[%c0_29, %c0_30] : memref<256x128xf32, #tpu.memory_space<vmem>>, vector<224x128xf32>
    %48 = arith.addf %47, %46 : vector<224x128xf32>
    %c0_31 = arith.constant 0 : index
    %c0_32 = arith.constant 0 : index
    %49 = vector.load %arg9[%c0_31, %c0_32] : memref<256x128xf32, #tpu.memory_space<vmem>>, vector<224x128xf32>
    tpu.vector_store %arg9[%c0_31, %c0_32], %48 {strides = array<i32>} : memref<256x128xf32, #tpu.memory_space<vmem>>, vector<224x128xf32>,
    %c0_33 = arith.constant 0 : index
    %c0_34 = arith.constant 0 : index
    %c0_35 = arith.constant 0 : index
    %c0_36 = arith.constant 0 : index
    %50 = vector.load %arg4[%c0_33, %c0_34, %c0_35, %c0_36] : memref<1x2x18x4xbf16, #tpu.memory_space<vmem>>, vector<1x2x18x4xbf16>
    %51 = vector.shape_cast %50 : vector<1x2x18x4xbf16> to vector<2x18x4xbf16>
    %52 = vector.extract_strided_slice %51 {offsets = [0, 0, 0], sizes = [2, 18, 4], strides = [1, 1, 1]} : vector<2x18x4xbf16> to vector<2x18x4xbf16>
    %c224 = arith.constant 224 : index
    %c0_37 = arith.constant 0 : index
    %53 = vector.load %arg9[%c224, %c0_37] : memref<256x128xf32, #tpu.memory_space<vmem>>, vector<32x128xf32>
    %54 = vector.extract_strided_slice %52 {offsets = [0, 0, 0], sizes = [2, 16, 4], strides = [1, 1, 1]} : vector<2x18x4xbf16> to vector<2x16x4xbf16>
    %55 = vector.extract_strided_slice %52 {offsets = [0, 1, 0], sizes = [2, 16, 4], strides = [1, 1, 1]} : vector<2x18x4xbf16> to vector<2x16x4xbf16>
    %56 = vector.extract_strided_slice %52 {offsets = [0, 2, 0], sizes = [2, 16, 4], strides = [1, 1, 1]} : vector<2x18x4xbf16> to vector<2x16x4xbf16>
    %57 = tpu.concatenate %54, %55, %56 in 2 : vector<2x16x4xbf16>, vector<2x16x4xbf16>, vector<2x16x4xbf16> -> vector<2x16x12xbf16>
    %58 = vector.shape_cast %57 : vector<2x16x12xbf16> to vector<32x12xbf16>
    %c2_38 = arith.constant 2 : index
    %c0_39 = arith.constant 0 : index
    %c0_40 = arith.constant 0 : index
    %59 = vector.load %arg5[%c2_38, %c0_39, %c0_40] : memref<3x12x128xbf16, #tpu.memory_space<vmem>>, vector<1x12x128xbf16>
    %60 = vector.shape_cast %59 : vector<1x12x128xbf16> to vector<12x128xbf16>
    %cst_41 = arith.constant dense<0.000000e+00> : vector<32x128xf32>
    %61 = tpu.matmul %58, %60, %cst_41 {dimension_numbers = #tpu.dot_dimension_numbers<[1], [0], [0], [1], [0, 0, 1, 1], [], []>} : vector<32x12xbf16>, vector<12x128xbf16>, vector<32x128xf32> -> vector<32x128xf32>
    %62 = arith.addf %53, %61 : vector<32x128xf32>
    %c224_42 = arith.constant 224 : index
    %c0_43 = arith.constant 0 : index
    %63 = vector.load %arg9[%c224_42, %c0_43] : memref<256x128xf32, #tpu.memory_space<vmem>>, vector<32x128xf32>
    tpu.vector_store %arg9[%c224_42, %c0_43], %62 {strides = array<i32>} : memref<256x128xf32, #tpu.memory_space<vmem>>, vector<32x128xf32>,
    %c0_44 = arith.constant 0 : index
    %c0_45 = arith.constant 0 : index
    %64 = vector.load %arg9[%c0_44, %c0_45] : memref<256x128xf32, #tpu.memory_space<vmem>>, vector<256x128xf32>
    %c0_46 = arith.constant 0 : index
    %c0_47 = arith.constant 0 : index
    %65 = vector.load %arg6[%c0_46, %c0_47] : memref<1x128xf32, #tpu.memory_space<vmem>>, vector<1x128xf32>
    %66 = vector.broadcast %65 : vector<1x128xf32> to vector<256x128xf32>
    %67 = arith.mulf %64, %66 : vector<256x128xf32>
    %c0_48 = arith.constant 0 : index
    %c0_49 = arith.constant 0 : index
    %68 = vector.load %arg7[%c0_48, %c0_49] : memref<1x128xf32, #tpu.memory_space<vmem>>, vector<1x128xf32>
    %69 = vector.broadcast %68 : vector<1x128xf32> to vector<256x128xf32>
    %70 = arith.addf %67, %69 : vector<256x128xf32>
    %71 = arith.negf %70 : vector<256x128xf32>
    %72 = math.exp %71 : vector<256x128xf32>
    %cst_50 = arith.constant 1.000000e+00 : f32
    %73 = vector.broadcast %cst_50 : f32 to vector<256x128xf32>
    %74 = arith.addf %73, %72 : vector<256x128xf32>
    %75 = arith.divf %73, %74 : vector<256x128xf32>
    %76 = arith.mulf %70, %75 : vector<256x128xf32>
    %77 = vector.shape_cast %76 : vector<256x128xf32> to vector<1x16x16x128xf32>
    %78 = arith.truncf %77 : vector<1x16x16x128xf32> to vector<1x16x16x128xbf16>
    %c0_51 = arith.constant 0 : index
    %c0_52 = arith.constant 0 : index
    %c0_53 = arith.constant 0 : index
    %c0_54 = arith.constant 0 : index
    %79 = vector.load %arg8[%c0_51, %c0_52, %c0_53, %c0_54] : memref<1x16x16x128xbf16, #tpu.memory_space<vmem>>, vector<1x16x16x128xbf16>
    tpu.vector_store %arg8[%c0_51, %c0_52, %c0_53, %c0_54], %78 {strides = array<i32>} : memref<1x16x16x128xbf16, #tpu.memory_space<vmem>>, vector<1x16x16x128xbf16>,
    return
  }
  func.func @transform_0(%arg0: i32, %arg1: i32, %arg2: i32) -> (i32, i32, i32, i32) {
    %c0_i32 = arith.constant 0 : i32
    %c0_i32_0 = arith.constant 0 : i32
    %c0_i32_1 = arith.constant 0 : i32
    return %arg0, %arg2, %c0_i32, %c0_i32_0 : i32, i32, i32, i32
  }
  func.func @transform_1(%arg0: i32, %arg1: i32, %arg2: i32) -> (i32, i32, i32, i32) {
    %c1_i32 = arith.constant 1 : i32
    %0 = arith.addi %arg2, %c1_i32 : i32
    %c8_i32 = arith.constant 8 : i32
    %1 = arith.muli %0, %c8_i32 : i32
    %c0_i32 = arith.constant 0 : i32
    %c0_i32_0 = arith.constant 0 : i32
    %c0_i32_1 = arith.constant 0 : i32
    return %arg0, %1, %c0_i32, %c0_i32_0 : i32, i32, i32, i32
  }
  func.func @transform_2(%arg0: i32, %arg1: i32, %arg2: i32) -> (i32, i32, i32) {
    %c0_i32 = arith.constant 0 : i32
    %c0_i32_0 = arith.constant 0 : i32
    %c0_i32_1 = arith.constant 0 : i32
    return %c0_i32, %c0_i32_0, %arg1 : i32, i32, i32
  }
  func.func @transform_3(%arg0: i32, %arg1: i32, %arg2: i32) -> (i32, i32) {
    %c0_i32 = arith.constant 0 : i32
    %c0_i32_0 = arith.constant 0 : i32
    return %c0_i32, %arg1 : i32, i32
  }
  func.func @transform_4(%arg0: i32, %arg1: i32, %arg2: i32) -> (i32, i32) {
    %c0_i32 = arith.constant 0 : i32
    %c0_i32_0 = arith.constant 0 : i32
    return %c0_i32, %arg1 : i32, i32
  }
  func.func @transform_5(%arg0: i32, %arg1: i32, %arg2: i32) -> (i32, i32, i32, i32) {
    %c0_i32 = arith.constant 0 : i32
    %c0_i32_0 = arith.constant 0 : i32
    return %arg0, %arg2, %c0_i32, %arg1 : i32, i32, i32, i32
  }
}

</mosaic_0001>

<bundles_post_ra>
// kernel: tpu_custom_call.1
= control target key start
LH: loop header
LB: loop body
LE: loop exit
PB: predicated region body
PF: predicated region fallthrough
CT: control target
= control target key end

     0   :  { %10 = vsyncpa [#allocation4], 0  ;;  %s4331_s0 = inlined_call_operand.vmem [shape: bf16[2,18,18,4], index: 0, kind: input, shape index: {}]   ;;  %s4332_s1 = inlined_call_operand.vmem [shape: bf16[2,18,18,4], index: 1, kind: input, shape index: {}]   ;;  %s4333_s2 = inlined_call_operand.vmem [shape: bf16[3,12,128], index: 2, kind: input, shape index: {}]   ;;  %s4334_s3 = inlined_call_operand.vmem [shape: f32[1,128], index: 3, kind: input, shape index: {}]   ;;  %s4335_s4 = inlined_call_operand.vmem [shape: f32[1,128], index: 4, kind: input, shape index: {}]   ;;  %s4336_s5 = inlined_call_operand.hbm [shape: bf16[2,16,16,128], index: 5, kind: output, shape index: {}]  }
   0x1   :  { %12 = vsyncpa [#allocation4 + $0x1], 0  ;;  %s3418_s18 = smov 0   ;;  %s3420_s19 = smov 0  }
   0x2   :  { %s3422_s20 = smov 0   ;;  %s3424_s21 = smov 0  }
   0x3   :  { %s3426_s22 = smov 0   ;;  %s3428_s23 = smov 0  }
   0x4 LB: > { %s2563_s24 = sadd.s32 4294967295, %s3380_s23   ;;  %s2564_s25 = sadd.s32 4294967294, %s3380_s23   ;;  %s3380_s23 = sphi %s3428_s23, %s18_s23   ;;  %s3376_s22 = sphi %s3426_s22, %s4343_s22   ;;  %s3372_s21 = sphi %s3424_s21, %s4342_s21   ;;  %s3368_s20 = sphi %s3422_s20, %s4341_s20   ;;  %s3364_s19 = sphi %s3420_s19, %s4340_s19   ;;  %s3360_s18 = sphi %s3418_s18, %s4339_s18  }
   0x5   : > { %s37_s26 = sadd.s32 1, %s3376_s22  ;;  %s186_s27 = sadd.s32 1, %s3368_s20 }
   0x6   : > { %p39_p0 = scmp.ge.s32.totalorder %s37_s26, 2  ;;  %p196_p1 = scmp.ne.s32.totalorder %s3368_s20, %s3364_s19 }
   0x7   : > { %p197_p2 = scmp.eq.s32.totalorder %s2563_s24, 1  ;;  %p202_p3 = scmp.ne.s32.totalorder %s3364_s19, %s3360_s18 }
   0x8   : > { %s4345_s26 = smov (%p39_p0, %s37_s26), 0  ;;  %p203_p5 = scmp.eq.s32.totalorder %s2564_s25, 1 }
   0x9   : > { %p3458_p4 = por %p197_p2, %p196_p1  ;;  %s179_s29 = ssub.s32 %s3376_s22, %s4345_s26 }
   0xa   : > { %p2570_p6 = scmp.ge.s32.totalorder %s3380_s23, 1  ;;  %p184_p7 = scmp.eq.s32.totalorder %s179_s29, 0 }
   0xb   : > { %p3465_p8 = por %p203_p5, %p202_p3  ;;  %p282_p9 = scmp.lt.s32.totalorder %s3380_s23, 3 }
   0xc   : > { %s3471_s6 = scalar_select %p184_p7, %s3368_s20, %s186_s27  }
   0xd   : > { %p283_p10 = pnand %p2570_p6, %p282_p9 }
   0xe   : > { %p348_p11 = scmp.lt.s32.totalorder (!%p283_p10), %s3372_s21, 1  ;;  %vm791_vm0 = vcmask (!%p283_p10), 1046528   ;;  %v3165_v0 = vld [vmem:[%s4333_s2] sm:$0x3f] (!%p283_p10)   ;;  %vm978_vm1 = vcmask (!%p283_p10), 1045504   ;;  %v3382_v1 = vmov (!%p283_p10), 0.0  }
   0xf   : > { %286 = sbr.rel (%p283_p10) target bundleno = 559 (0x22f), region = 40  ;;  %vm566_vm2 = vsmask.f32 (!%p283_p10), 7424  ;;  %2961 = vmatprep.subr.bf16.mxu1 (!%p283_p10), %v3382_v1  ;;  %v3166_v2 = vld [vmem:[%s4333_s2 + $0x8] sm:$0x3f] (!%p283_p10)   ;;  %3065 = vmatprep.subr.msk.bf16.mxu0 (!%p283_p10), %vm978_vm1, %v3165_v0  ;;  %v980_v3 = vsel (!%p283_p10), %vm978_vm1, %v3165_v0, 0 }
  0x10   : > { %2928 = vmatpush3.bf16.msra.mxu0 (!%p283_p10), %v980_v3  ;;  %v1184_v7 = vsel (!%p283_p10), %vm978_vm1, %v3166_v2, 0  ;;  %s3383_s16 = smov (!%p283_p10), 8   ;;  %s3384_s17 = smov (!%p283_p10), 4   ;;  %vm3385_vm3 = vmmov (!%p283_p10), 0   ;;  %vm872_vm4 = vcmask (!%p283_p10), 31744   ;;  %vm905_vm5 = vcmask (!%p283_p10), 64512  }
  0x11   : > { %3023 = vmatprep.subr.bf16.mxu0 (!%p283_p10), %v3382_v1  ;;  %2962 = vmatpush3.bf16.msra.mxu1 (!%p283_p10), %v1184_v7  ;;  %vm945_vm6 = vcmask (!%p283_p10), 97280   ;;  %s3386_s12 = smov (!%p283_p10), [#allocation3]  }
  0x12   : > { %2963 = vmatprep.mubr.msk.bf16.mxu1 (!%p283_p10), %vm3385_vm3, %v3382_v1  ;;  %s3306_s13 = sshll.u32 (!%p283_p10), %s3386_s12, 4  ;;  %s3307_s13 = int_to_ptr.vmem [resolvable:$false] %s3306_s13 }
  0x13   : > { %s3308_s14 = scalar_lea.vmem (!%p283_p10), %s3307_s13, 4096 }
  0x16   : > { %s3475_s7 = scalar_select %p348_p11, %s3372_s21, 1 }
  0x18   : > { %s3068_s8 = smul.u32 216, %s3475_s7 }
  0x1a   : > { %s3490_s15 = scalar_lea.vmem %s4331_s0, %s3068_s8  ;;  %s2745_s24 = sadd.s32 192, %s3068_s8 }
  0x1b   : > { %v3495_v4 = vld [vmem:[%s3490_s15] sm:$0xff]   ;;  %v3132_v5 = vld [vmem:[%s3490_s15 + $0x8] ss:$0 sps:$4 sm:$0x11]   ;;  %v3500_v6 = vld [vmem:[%s3490_s15 + $0xc] sm:$0xff]   ;;  %s3642_s29 = scalar_lea.vmem %s4332_s1, %s2745_s24  ;;  %s339_s24 = sand.u32 1, %s3364_s19  }
  0x1c   : > { %v792_v8 = vrot.slane %v3495_v4, 1  ;;  %v793_v9 = vrot.slane %v3132_v5, 1  ;;  %v568_v10 = vshrl.u32 %v3495_v4, 16  ;;  %v570_v11 = vshll.u32 %v3495_v4, 16  ;;  %v3513_v22 = vld [vmem:[%s3490_s15 + $0x24] sm:$0xff]   ;;  %v3520_v30 = vld [vmem:[%s3490_s15 + $0x18] sm:$0xff]  }
  0x1d   : > { %v575_v12 = vshll.u32 %v3132_v5, 16  ;;  %v3134_v13 = vld [vmem:[%s3490_s15 + $0x14] ss:$0 sps:$4 sm:$0x11]   ;;  %v795_v14 = vrot.slane %v3500_v6, 1  ;;  %v580_v15 = vshrl.u32 %v3500_v6, 16 }
  0x1e   : > { %v794_v16 = vsel %vm791_vm0, %v792_v8, %v793_v9  ;;  %v572_v17 = vrot.slane %v570_v11, 1  ;;  %v582_v18 = vshll.u32 %v3500_v6, 16  ;;  %v796_v20 = vrot.slane %v3134_v13, 1  ;;  %v3136_v25 = vld [vmem:[%s3490_s15 + $0x2c] ss:$0 sps:$4 sm:$0x11]  }
  0x1f   : > { %840 = vrot.lane.b32.xlu1 %v794_v16, %s3383_s16  ;;  %v577_v19 = vrot.slane %v575_v12, 1  ;;  %v587_v21 = vshll.u32 %v3134_v13, 16  ;;  %v604_v28 = vshrl.u32 %v3513_v22, 16  ;;  %v606_v29 = vshll.u32 %v3513_v22, 16  ;;  %v3525_v35 = vld [vmem:[%s3490_s15 + $0x3c] sm:$0xff]   ;;  %v3534_v44 = vld [vmem:[%s3490_s15 + $0x30] sm:$0xff]  }
  0x20   : > { %v573_v23 = vor.u32 %v572_v17, %v568_v10  ;;  %v584_v24 = vrot.slane %v582_v18, 1  ;;  %v797_v26 = vsel %vm791_vm0, %v795_v14, %v796_v20  ;;  %v611_v33 = vshll.u32 %v3136_v25, 16  ;;  %v3138_v34 = vld [vmem:[%s3490_s15 + $0x20] ss:$0 sps:$4 sm:$0x11]   ;;  %v3549_v62 = vld [vmem:[%s3490_s15 + $0x54] sm:$0xff]  }
  0x21   : > { %v589_v27 = vrot.slane %v587_v21, 1  ;;  %v608_v36 = vrot.slane %v606_v29, 1  ;;  %v592_v37 = vshrl.u32 %v3520_v30, 16  ;;  %v594_v38 = vshll.u32 %v3520_v30, 16  ;;  %v3552_v5 = vld [vmem:[%s3490_s15 + $0x48] sm:$0xff]   ;;  %v3573_v29 = vld [vmem:[%s3490_s15 + $0x60] sm:$0xff]  }
  0x22   : > { %v578_v31 = vsel %vm566_vm2, %v573_v23, %v577_v19  ;;  %v585_v32 = vor.u32 %v584_v24, %v580_v15  ;;  %v801_v39 = vrot.slane %v3513_v22, 1  ;;  %v613_v41 = vrot.slane %v611_v33, 1  ;;  %v3140_v49 = vld [vmem:[%s3490_s15 + $0x44] ss:$0 sps:$4 sm:$0x11]   ;;  %v3563_v17 = vld [vmem:[%s3490_s15 + $0x6c] sm:$0xff]  }
  0x23   : > { %759 = vrot.lane.b32.xlu0 %v578_v31, %s3384_s17  ;;  %842 = vrot.lane.b32.xlu1 %v797_v26, %s3383_s16  ;;  %v599_v42 = vshll.u32 %v3138_v34, 16  ;;  %v802_v43 = vrot.slane %v3136_v25, 1  ;;  %v609_v45 = vor.u32 %v608_v36, %v604_v28  ;;  %v596_v46 = vrot.slane %v594_v38, 1  ;;  %v3142_v58 = vld [vmem:[%s3490_s15 + $0x38] ss:$0 sps:$4 sm:$0x11]  }
  0x24   : > { %v590_v40 = vsel %vm566_vm2, %v585_v32, %v589_v27  ;;  %v798_v47 = vrot.slane %v3520_v30, 1  ;;  %v628_v50 = vshrl.u32 %v3525_v35, 16  ;;  %v630_v51 = vshll.u32 %v3525_v35, 16  ;;  %v3144_v8 = vld [vmem:[%s3490_s15 + $0x5c] ss:$0 sps:$4 sm:$0x11]  }
  0x25   : > { %v601_v48 = vrot.slane %v599_v42, 1  ;;  %v614_v52 = vsel %vm566_vm2, %v609_v45, %v613_v41  ;;  %v597_v53 = vor.u32 %v596_v46, %v592_v37  ;;  %v799_v54 = vrot.slane %v3138_v34, 1  ;;  %v3146_v18 = vld [vmem:[%s3490_s15 + $0x50] ss:$0 sps:$4 sm:$0x11]   ;;  %v3586_v45 = vld [vmem:[%s3490_s15 + $0x84] sm:$0xff]  }
  0x26   : > { %v616_v55 = vshrl.u32 %v3534_v44, 16  ;;  %v632_v56 = vrot.slane %v630_v51, 1  ;;  %v635_v57 = vshll.u32 %v3140_v49, 16  ;;  %v618_v59 = vshll.u32 %v3534_v44, 16  ;;  %s4105_s25 = sshll.u32 %s339_s24, 7 }
  0x27   : > { %761 = vrot.lane.b32.xlu0 %v590_v40, %s3384_s17  ;;  %765 = vrot.lane.b32.xlu1 %v614_v52, %s3384_s17  ;;  %v602_v60 = vsel %vm566_vm2, %v597_v53, %v601_v48  ;;  %v803_v61 = vsel %vm791_vm0, %v801_v39, %v802_v43  ;;  %v623_v3 = vshll.u32 %v3142_v58, 16  ;;  %v807_v7 = vrot.slane %v3525_v35, 1  ;;  %v3148_v33 = vld [vmem:[%s3490_s15 + $0x74] ss:$0 sps:$4 sm:$0x11]   ;;  %v3596_v53 = vld [vmem:[%s3490_s15 + $0x78] sm:$0xff]  }
  0x28   : > { %v633_v63 = vor.u32 %v632_v56, %v628_v50  ;;  %v637_v0 = vrot.slane %v635_v57, 1  ;;  %v620_v2 = vrot.slane %v618_v59, 1  ;;  %v800_v9 = vsel %vm791_vm0, %v798_v47, %v799_v54  ;;  %v3150_v42 = vld [vmem:[%s3490_s15 + $0x68] ss:$0 sps:$4 sm:$0x11]   ;;  %s4128_s27 = scalar_lea.vmem [#allocation3], %s4105_s25 }
  0x29   : > { %v625_v11 = vrot.slane %v623_v3, 1  ;;  %v808_v12 = vrot.slane %v3140_v49, 1  ;;  %v652_v14 = vshrl.u32 %v3549_v62, 16  ;;  %v654_v15 = vshll.u32 %v3549_v62, 16  ;;  %s2417_s7 = sshll.u32 %s4128_s27, 4  ;;  %s4279_s7 = int_to_ptr.vmem [resolvable:$true] %s2417_s7 }
  0x2a   : > { %v621_v10 = vor.u32 %v620_v2, %v616_v55  ;;  %v638_v13 = vsel %vm566_vm2, %v633_v63, %v637_v0  ;;  %v659_v16 = vshll.u32 %v3144_v8, 16  ;;  %v642_v19 = vshll.u32 %v3552_v5, 16  ;;  %v3593_v52 = vld [vmem:[%s3490_s15 + $0x8c] ss:$0 sps:$4 sm:$0x11]   ;;  %s3302_s11 = scalar_lea.vmem %s4279_s7, 2048  ;;  %p3309_p1 = scmp.lt.s32.totalorder %s4279_s7, %s3307_s13 }
  0x2b   : > { %763 = vrot.lane.b32.xlu0 %v602_v60, %s3384_s17  ;;  %846 = vrot.lane.b32.xlu1 %v803_v61, %s3383_s16  ;;  %v804_v20 = vrot.slane %v3534_v44, 1  ;;  %v805_v21 = vrot.slane %v3142_v58, 1  ;;  %v656_v23 = vrot.slane %v654_v15, 1  ;;  %v640_v24 = vshrl.u32 %v3552_v5, 16  ;;  %p3303_p12 = scmp.ne.s32.totalorder %s4279_s7, %s3302_s11  ;;  %p3310_p2 = scmp.lt.s32.totalorder %s3308_s14, %s3302_s11 }
  0x2c   : > { %v626_v25 = vsel %vm566_vm2, %v621_v10, %v625_v11  ;;  %v661_v26 = vrot.slane %v659_v16, 1  ;;  %v644_v27 = vrot.slane %v642_v19, 1  ;;  %v647_v28 = vshll.u32 %v3146_v18, 16  ;;  %v3154_v3 = vld [vmem:[%s3490_s15 + $0x80] ss:$0 sps:$4 sm:$0x11]  }
  0x2d   : > { %v809_v31 = vsel %vm791_vm0, %v807_v7, %v808_v12  ;;  %v657_v32 = vor.u32 %v656_v23, %v652_v14  ;;  %v678_v34 = vshll.u32 %v3563_v17, 16  ;;  %v813_v36 = vrot.slane %v3549_v62, 1  ;;  %v3620_v23 = vld [vmem:[%s3490_s15 + $0x90] sm:$0xff]   ;;  %p3304_p13 = pnand %p3303_p12, %p3458_p4  ;;  %p3311_p3 = por %p3310_p2, %p3309_p1 }
  0x2e   : > { %v814_v37 = vrot.slane %v3144_v8, 1  ;;  %v676_v38 = vshrl.u32 %v3563_v17, 16  ;;  %v806_v39 = vsel %vm791_vm0, %v804_v20, %v805_v21  ;;  %v645_v40 = vor.u32 %v644_v27, %v640_v24 }
  0x2f   : > { %844 = vrot.lane.b32.xlu0 %v800_v9, %s3383_s16  ;;  %769 = vrot.lane.b32.xlu1 %v638_v13, %s3384_s17  ;;  %v649_v41 = vrot.slane %v647_v28, 1  ;;  %v666_v43 = vshll.u32 %v3573_v29, 16  ;;  %v662_v46 = vsel %vm566_vm2, %v657_v32, %v661_v26  ;;  %v680_v47 = vrot.slane %v678_v34, 1  ;;  %v3612_v13 = vld [vmem:[%s3490_s15 + $0x9c] sm:$0xff]   ;;  %p3305_p0 = pneg %p3304_p13 }
  0x30   : > { %v683_v48 = vshll.u32 %v3148_v33, 16  ;;  %v810_v49 = vrot.slane %v3552_v5, 1  ;;  %v811_v50 = vrot.slane %v3146_v18, 1  ;;  %v664_v51 = vshrl.u32 %v3573_v29, 16 }
  0x31   : > { %v650_v54 = vsel %vm566_vm2, %v645_v40, %v649_v41  ;;  %v668_v55 = vrot.slane %v666_v43, 1  ;;  %v671_v56 = vshll.u32 %v3150_v42, 16  ;;  %v815_v57 = vsel %vm791_vm0, %v813_v36, %v814_v37  ;;  %v3156_v26 = vld [vmem:[%s3490_s15 + $0xa4] ss:$0 sps:$4 sm:$0x11]   ;;  %p3312_p5 = pnand %p3311_p3, %p3305_p0 }
  0x32   : > { %v681_v58 = vor.u32 %v680_v47, %v676_v38  ;;  %v685_v59 = vrot.slane %v683_v48, 1  ;;  %v702_v60 = vshll.u32 %v3586_v45, 16  ;;  %v819_v61 = vrot.slane %v3563_v17, 1  ;;  %v3158_v36 = vld [vmem:[%s3490_s15 + $0x98] ss:$0 sps:$4 sm:$0x11]  }
  0x33   : > { %767 = vrot.lane.b32.xlu0 %v626_v25, %s3384_s17  ;;  %850 = vrot.lane.b32.xlu1 %v809_v31, %s3383_s16  ;;  %v820_v63 = vrot.slane %v3148_v33, 1  ;;  %v812_v0 = vsel %vm791_vm0, %v810_v49, %v811_v50  ;;  %v700_v2 = vshrl.u32 %v3586_v45, 16  ;;  %v669_v7 = vor.u32 %v668_v55, %v664_v51  ;;  %v3160_v51 = vld [vmem:[%s3490_s15 + $0xbc] ss:$0 sps:$4 sm:$0x11]  }
  0x34   : > { %v673_v8 = vrot.slane %v671_v56, 1  ;;  %v707_v9 = vshll.u32 %v3593_v52, 16  ;;  %v690_v10 = vshll.u32 %v3596_v53, 16  ;;  %v686_v11 = vsel %vm566_vm2, %v681_v58, %v685_v59 }
  0x35   : > { %v704_v12 = vrot.slane %v702_v60, 1  ;;  %v816_v14 = vrot.slane %v3573_v29, 1  ;;  %v817_v15 = vrot.slane %v3150_v42, 1  ;;  %v695_v16 = vshll.u32 %v3154_v3, 16  ;;  %v3637_v42 = vld [vmem:[%s3490_s15 + $0xb4] sm:$0xff]  }
  0x36   : > { %v674_v18 = vsel %vm566_vm2, %v669_v7, %v673_v8  ;;  %v709_v19 = vrot.slane %v707_v9, 1  ;;  %v688_v20 = vshrl.u32 %v3596_v53, 16  ;;  %v692_v21 = vrot.slane %v690_v10, 1  ;;  %v3668_v10 = vld [vmem:[%s4333_s2 + $0x10] sm:$0x3f]  }
  0x37   : > { %848 = vrot.lane.b32.xlu0 %v806_v39, %s3383_s16  ;;  %773 = vrot.lane.b32.xlu1 %v662_v46, %s3384_s17  ;;  %v821_v24 = vsel %vm791_vm0, %v819_v61, %v820_v63  ;;  %v705_v25 = vor.u32 %v704_v12, %v700_v2  ;;  %v726_v27 = vshll.u32 %v3612_v13, 16  ;;  %v825_v28 = vrot.slane %v3586_v45, 1  ;;  %v3162_v61 = vld [vmem:[%s3490_s15 + $0xb0] ss:$0 sps:$4 sm:$0x11]  }
  0x38   : > { %v697_v31 = vrot.slane %v695_v16, 1  ;;  %v826_v32 = vrot.slane %v3593_v52, 1  ;;  %v818_v33 = vsel %vm791_vm0, %v816_v14, %v817_v15  ;;  %v693_v34 = vor.u32 %v692_v21, %v688_v20  ;;  %v3651_v52 = vld [vmem:[%s3490_s15 + $0xa8] sm:$0xff]   ;;  %3067 = vmatprep.subr.msk.bf16.mxu1 %vm978_vm1, %v3668_v10 }
  0x39   : > { %v714_v37 = vshll.u32 %v3620_v23, 16  ;;  %v710_v38 = vsel %vm566_vm2, %v705_v25, %v709_v19  ;;  %v724_v39 = vshrl.u32 %v3612_v13, 16  ;;  %v728_v40 = vrot.slane %v726_v27, 1  ;;  %v3676_v19 = vld [vmem:[%s3642_s29] sm:$0xff]   ;;  %v3682_v25 = vld [vmem:[%s3642_s29 + $0xc] sm:$0xff]  }
  0x3a   : > { %v731_v41 = vshll.u32 %v3156_v26, 16  ;;  %v822_v43 = vrot.slane %v3596_v53, 1  ;;  %v823_v46 = vrot.slane %v3154_v3, 1  ;;  %v712_v47 = vshrl.u32 %v3620_v23, 16 }
  0x3b   : > { %771 = vrot.lane.b32.xlu0 %v650_v54, %s3384_s17  ;;  %854 = vrot.lane.b32.xlu1 %v815_v57, %s3383_s16  ;;  %v698_v48 = vsel %vm566_vm2, %v693_v34, %v697_v31  ;;  %v716_v49 = vrot.slane %v714_v37, 1  ;;  %v719_v50 = vshll.u32 %v3158_v36, 16  ;;  %v827_v54 = vsel %vm791_vm0, %v825_v28, %v826_v32 }
  0x3c   : > { %v729_v55 = vor.u32 %v728_v40, %v724_v39  ;;  %v733_v56 = vrot.slane %v731_v41, 1  ;;  %v750_v57 = vshll.u32 %v3637_v42, 16  ;;  %v831_v58 = vrot.slane %v3612_v13, 1 }
  0x3d   : > { %v832_v59 = vrot.slane %v3156_v26, 1  ;;  %v748_v60 = vshrl.u32 %v3637_v42, 16  ;;  %v824_v63 = vsel %vm791_vm0, %v822_v43, %v823_v46  ;;  %v721_v2 = vrot.slane %v719_v50, 1 }
  0x3e   : > { %v738_v3 = vshll.u32 %v3651_v52, 16  ;;  %v734_v7 = vsel %vm566_vm2, %v729_v55, %v733_v56  ;;  %v752_v8 = vrot.slane %v750_v57, 1  ;;  %v755_v9 = vshll.u32 %v3160_v51, 16 }
  0x3f   : > { %852 = vrot.lane.b32.xlu0 %v812_v0, %s3383_s16  ;;  %777 = vrot.lane.b32.xlu1 %v686_v11, %s3384_s17  ;;  %v717_v0 = vor.u32 %v716_v49, %v712_v47  ;;  %v828_v11 = vrot.slane %v3620_v23, 1  ;;  %v829_v12 = vrot.slane %v3158_v36, 1  ;;  %v736_v15 = vshrl.u32 %v3651_v52, 16  ;;  %v3691_v36 = vld [vmem:[%s3642_s29] sm:$0xff]  }
  0x40   : > { %v740_v16 = vrot.slane %v738_v3, 1  ;;  %v833_v20 = vsel %vm791_vm0, %v831_v58, %v832_v59  ;;  %v753_v21 = vor.u32 %v752_v8, %v748_v60  ;;  %v837_v26 = vrot.slane %v3637_v42, 1 }
  0x41   : > { %v722_v14 = vsel %vm566_vm2, %v717_v0, %v721_v2  ;;  %v838_v27 = vrot.slane %v3160_v51, 1  ;;  %v830_v28 = vsel %vm791_vm0, %v828_v11, %v829_v12  ;;  %v1445_v34 = vshll.u32 %v3676_v19, 16  ;;  %v3168_v51 = vld [vmem:[%s3642_s29 + $0x8] ss:$0 sps:$4 sm:$0x11]  }
  0x42   : > { %v741_v31 = vor.u32 %v740_v16, %v736_v15  ;;  %v1803_v39 = vshll.u32 %v3682_v25, 16  ;;  %v834_v40 = vrot.slane %v3651_v52, 1  ;;  %v835_v43 = vrot.slane %v3162_v61, 1 }
  0x43   : > { %775 = vrot.lane.b32.xlu0 %v674_v18, %s3384_s17  ;;  %858 = vrot.lane.b32.xlu1 %v821_v24, %s3383_s16  ;;  %v743_v18 = vshll.u32 %v3162_v61, 16  ;;  %v757_v24 = vrot.slane %v755_v9, 1  ;;  %v839_v41 = vsel %vm791_vm0, %v837_v26, %v838_v27  ;;  %v1443_v46 = vshrl.u32 %v3676_v19, 16 }
  0x44   : > { %v1456_v47 = vrot.slane %v3676_v19, 1  ;;  %v1447_v49 = vrot.slane %v1445_v34, 1  ;;  %v1801_v56 = vshrl.u32 %v3682_v25, 16  ;;  %v1805_v57 = vrot.slane %v1803_v39, 1 }
  0x45   : > { %v745_v32 = vrot.slane %v743_v18, 1  ;;  %v758_v37 = vsel %vm566_vm2, %v753_v21, %v757_v24  ;;  %v836_v59 = vsel %vm791_vm0, %v834_v40, %v835_v43  ;;  %v1789_v60 = vshrl.u32 %v3691_v36, 16 }
  0x46   : > { %v1448_v61 = vor.u32 %v1447_v49, %v1443_v46  ;;  %v1796_v2 = vshll.u32 %v3168_v51, 16  ;;  %v1819_v15 = vrot.slane %v3682_v25, 1  ;;  %v1817_v21 = vrot.slane %v3168_v51, 1 }
  0x47   : > { %856 = vrot.lane.b32.xlu0 %v818_v33, %s3383_s16  ;;  %781 = vrot.lane.b32.xlu1 %v710_v38, %s3384_s17  ;;  %v3164_v33 = vld [vmem:[%s3642_s29 + $0x8] ss:$0 sps:$4 sm:$0x11]   ;;  %v3170_v38 = vld [vmem:[%s3642_s29 + $0x14] ss:$0 sps:$4 sm:$0x11]  }
  0x48   : > { %v1450_v50 = vshll.u32 %v3164_v33, 16  ;;  %v1457_v55 = vrot.slane %v3164_v33, 1  ;;  %v1808_v58 = vshll.u32 %v3170_v38, 16  ;;  %v1798_v12 = vrot.slane %v1796_v2, 1  ;;  %v3172_v33 = vld [vmem:[%s4333_s2 + $0x8] sm:$0x3f]  }
  0x49   : > { %v1820_v16 = vrot.slane %v3170_v38, 1  ;;  %v1475_v40 = vsel %vm978_vm1, %v3172_v33, 0  ;;  %s2778_s29 = sshll.u32 %s3372_s21, 11  ;;  %s4284_s21 = scalar_lea.sflag [#allocation4], %s339_s24 }
  0x4a   : > { %v1458_v3 = vsel %vm791_vm0, %v1456_v47, %v1457_v55  ;;  %v1810_v8 = vrot.slane %v1808_v58, 1  ;;  %s4276_s10 = scalar_lea.hbm %s4336_s5, %s2778_s29 }
  0x4b   : > { %779 = vrot.lane.b32.xlu0 %v698_v48, %s3384_s17  ;;  %862 = vrot.lane.b32.xlu1 %v827_v54, %s3383_s16  ;;  %v746_v48 = vsel %vm566_vm2, %v741_v31, %v745_v32  ;;  %v1791_v54 = vshll.u32 %v3691_v36, 16  ;;  %v1821_v24 = vsel %vm791_vm0, %v1819_v15, %v1820_v16 }
  0x4d   : > { %v1793_v0 = vrot.slane %v1791_v54, 1 }
  0x4f   : > { %860 = vrot.lane.b32.xlu0 %v824_v63, %s3383_s16  ;;  %785 = vrot.lane.b32.xlu1 %v734_v7, %s3384_s17  ;;  %v1452_v63 = vrot.slane %v1450_v50, 1  ;;  %v1806_v7 = vor.u32 %v1805_v57, %v1801_v56  ;;  %v1794_v11 = vor.u32 %v1793_v0, %v1789_v60 }
  0x51   : > { %v1453_v9 = vsel %vm566_vm2, %v1448_v61, %v1452_v63  ;;  %v1799_v18 = vsel %vm566_vm2, %v1794_v11, %v1798_v12 }
  0x53   : > { %783 = vrot.lane.b32.xlu0 %v722_v14, %s3384_s17  ;;  %866 = vrot.lane.b32.xlu1 %v833_v20, %s3383_s16  ;;  %v1811_v14 = vsel %vm566_vm2, %v1806_v7, %v1810_v8  ;;  %v1816_v20 = vrot.slane %v3691_v36, 1 }
  0x55   : > { %v1818_v26 = vsel %vm791_vm0, %v1816_v20, %v1817_v21 }
  0x57   : > { %864 = vrot.lane.b32.xlu0 %v830_v28, %s3383_s16  ;;  %789 = vrot.lane.b32.xlu1 %v758_v37, %s3384_s17 }
  0x5b   : > { %787 = vrot.lane.b32.xlu0 %v746_v48, %s3384_s17  ;;  %870 = vrot.lane.b32.xlu1 %v839_v41, %s3383_s16  ;;  %v1846_v41 = vsel %vm978_vm1, %v3668_v10, 0 }
  0x5f   : > { %868 = vrot.lane.b32.xlu0 %v836_v59, %s3383_s16  ;;  %1459 = vrot.lane.b32.xlu1 %v1458_v3, %s3383_s16 }
  0x63   : > { %1454 = vrot.lane.b32.xlu0 %v1453_v9, %s3384_s17  ;;  %1814 = vrot.lane.b32.xlu1 %v1811_v14, %s3384_s17 }
  0x67   : > { %1812 = vrot.lane.b32.xlu0 %v1799_v18, %s3384_s17  ;;  %1824 = vrot.lane.b32.xlu1 %v1821_v24, %s3383_s16 }
  0x6b   : > { %1822 = vrot.lane.b32.xlu0 %v1818_v26, %s3383_s16 }
  0x91   : > { %v841_v27 = vpop.permute.xlu1 %840 }
  0x95   : > { %v760_v28 = vpop.permute.xlu0 %759  ;;  %v843_v31 = vpop.permute.xlu1 %842 }
  0x96   : > { %v874_v32 = vsel %vm872_vm4, %v3495_v4, %v760_v28  ;;  %v3740_v4 = vld [vmem:[%s4333_s2 + $0x10] sm:$0x3f]  }
  0x97   : > { %v907_v34 = vsel %vm905_vm5, %v874_v32, %v841_v27 }
  0x98   : > { %2929 = vmatprep.mubr.msk.bf16.mxu0 %vm945_vm6, %v907_v34 }
  0x99   : > { %v762_v37 = vpop.permute.xlu0 %761  ;;  %v766_v39 = vpop.permute.xlu1 %765 }
  0x9a   : > { %v876_v38 = vsel %vm872_vm4, %v3500_v6, %v762_v37  ;;  %v880_v10 = vsel %vm872_vm4, %v3513_v22, %v766_v39 }
  0x9b   : > { %v909_v43 = vsel %vm905_vm5, %v876_v38, %v843_v31 }
  0x9c   : > { %2930 = vmatmul.mubr.msk.bf16.vlgmr.msra.gmra.mrb[0].mxu0 %vm945_vm6, %v909_v43  ;;  %2964 = vmatmul.mubr.msk.bf16.vlgmr.msra.gmra.mrb[0].mxu1 %vm945_vm6, %v909_v43 }
  0x9d   : > { %3024 = vmatpush3.bf16.msra.mxu0 %v1475_v40  ;;  %3060 = vmatpush3.bf16.msra.mxu1 %v1846_v41  ;;  %v764_v6 = vpop.permute.xlu0 %763  ;;  %v847_v46 = vpop.permute.xlu1 %846 }
  0x9e   : > { %2967 = vmatprep.mubr.msk.bf16.mxu1 %vm3385_vm3, %v3382_v1  ;;  %3066 = vmatprep.subr.msk.bf16.mxu0 %vm978_vm1, %v3740_v4  ;;  %v878_v47 = vsel %vm872_vm4, %v3520_v30, %v764_v6  ;;  %v3757_v51 = vsel %vm905_vm5, %v880_v10, %v847_v46  ;;  %v1531_v6 = vsel %vm978_vm1, %v3740_v4, 0 }
  0xa1   : > { %v845_v48 = vpop.permute.xlu0 %844  ;;  %v770_v50 = vpop.permute.xlu1 %769 }
  0xa2   : > { %v3754_v49 = vsel %vm905_vm5, %v878_v47, %v845_v48  ;;  %v884_v54 = vsel %vm872_vm4, %v3525_v35, %v770_v50 }
  0xa3   : > { %2933 = vmatprep.mubr.msk.bf16.mxu0 %vm945_vm6, %v3754_v49 }
  0xa4   : > { %2934 = vmatmul.mubr.msk.bf16.gmra.mrb[4].mxu0 %vm945_vm6, %v3757_v51  ;;  %2968 = vmatmul.mubr.msk.bf16.gmra.mrb[4].mxu1 %vm945_vm6, %v3754_v49 }
  0xa5   : > { %v768_v22 = vpop.permute.xlu0 %767  ;;  %2971 = vmatprep.mubr.msk.bf16.mxu1 %vm3385_vm3, %v3382_v1  ;;  %v851_v30 = vpop.permute.xlu1 %850 }
  0xa6   : > { %v882_v55 = vsel %vm872_vm4, %v3534_v44, %v768_v22  ;;  %v3775_v59 = vsel %vm905_vm5, %v884_v54, %v851_v30 }
  0xa9   : > { %v849_v56 = vpop.permute.xlu0 %848  ;;  %v774_v58 = vpop.permute.xlu1 %773 }
  0xaa   : > { %v3772_v57 = vsel %vm905_vm5, %v882_v55, %v849_v56  ;;  %v888_v60 = vsel %vm872_vm4, %v3549_v62, %v774_v58 }
  0xab   : > { %2937 = vmatprep.mubr.msk.bf16.mxu0 %vm945_vm6, %v3772_v57 }
  0xac   : > { %2938 = vmatmul.mubr.msk.bf16.gmra.mrb[8].mxu0 %vm945_vm6, %v3775_v59  ;;  %2972 = vmatmul.mubr.msk.bf16.gmra.mrb[8].mxu1 %vm945_vm6, %v3757_v51 }
  0xad   : > { %v772_v35 = vpop.permute.xlu0 %771  ;;  %2975 = vmatprep.mubr.msk.bf16.mxu1 %vm3385_vm3, %v3382_v1  ;;  %v855_v44 = vpop.permute.xlu1 %854 }
  0xae   : > { %v886_v61 = vsel %vm872_vm4, %v3552_v5, %v772_v35  ;;  %v3793_v3 = vsel %vm905_vm5, %v888_v60, %v855_v44 }
  0xb1   : > { %v853_v63 = vpop.permute.xlu0 %852  ;;  %v778_v2 = vpop.permute.xlu1 %777 }
  0xb2   : > { %v3790_v0 = vsel %vm905_vm5, %v886_v61, %v853_v63  ;;  %v892_v7 = vsel %vm872_vm4, %v3563_v17, %v778_v2 }
  0xb3   : > { %2941 = vmatprep.mubr.msk.bf16.mxu0 %vm945_vm6, %v3790_v0 }
  0xb4   : > { %2942 = vmatmul.mubr.msk.bf16.gmra.mrb[12].mxu0 %vm945_vm6, %v3793_v3  ;;  %2976 = vmatmul.mubr.msk.bf16.gmra.mrb[12].mxu1 %vm945_vm6, %v3772_v57 }
  0xb5   : > { %v776_v62 = vpop.permute.xlu0 %775  ;;  %2979 = vmatprep.mubr.msk.bf16.mxu1 %vm3385_vm3, %v3382_v1  ;;  %v859_v5 = vpop.permute.xlu1 %858 }
  0xb6   : > { %v890_v8 = vsel %vm872_vm4, %v3573_v29, %v776_v62  ;;  %v3811_v14 = vsel %vm905_vm5, %v892_v7, %v859_v5 }
  0xb9   : > { %v857_v9 = vpop.permute.xlu0 %856  ;;  %v782_v12 = vpop.permute.xlu1 %781 }
  0xba   : > { %v3808_v11 = vsel %vm905_vm5, %v890_v8, %v857_v9  ;;  %v896_v15 = vsel %vm872_vm4, %v3586_v45, %v782_v12 }
  0xbb   : > { %2945 = vmatprep.mubr.msk.bf16.mxu0 %vm945_vm6, %v3808_v11 }
  0xbc   : > { %2946 = vmatmul.mubr.msk.bf16.gmra.mrb[16].mxu0 %vm945_vm6, %v3811_v14  ;;  %2980 = vmatmul.mubr.msk.bf16.gmra.mrb[16].mxu1 %vm945_vm6, %v3775_v59 }
  0xbd   : > { %v780_v17 = vpop.permute.xlu0 %779  ;;  %2983 = vmatprep.mubr.msk.bf16.mxu1 %vm3385_vm3, %v3382_v1  ;;  %v863_v29 = vpop.permute.xlu1 %862 }
  0xbe   : > { %v894_v16 = vsel %vm872_vm4, %v3596_v53, %v780_v17  ;;  %v929_v24 = vsel %vm905_vm5, %v896_v15, %v863_v29 }
  0xc1   : > { %v861_v18 = vpop.permute.xlu0 %860  ;;  %v786_v21 = vpop.permute.xlu1 %785 }
  0xc2   : > { %v927_v20 = vsel %vm905_vm5, %v894_v16, %v861_v18  ;;  %v900_v53 = vsel %vm872_vm4, %v3612_v13, %v786_v21 }
  0xc3   : > { %2949 = vmatprep.mubr.msk.bf16.mxu0 %vm945_vm6, %v927_v20 }
  0xc4   : > { %2950 = vmatmul.mubr.msk.bf16.gmra.mrb[20].mxu0 %vm945_vm6, %v929_v24  ;;  %2984 = vmatmul.mubr.msk.bf16.gmra.mrb[20].mxu1 %vm945_vm6, %v3790_v0 }
  0xc5   : > { %v784_v26 = vpop.permute.xlu0 %783  ;;  %2987 = vmatprep.mubr.msk.bf16.mxu1 %vm3385_vm3, %v3382_v1  ;;  %v867_v45 = vpop.permute.xlu1 %866 }
  0xc6   : > { %v898_v27 = vsel %vm872_vm4, %v3620_v23, %v784_v26  ;;  %v933_v33 = vsel %vm905_vm5, %v900_v53, %v867_v45 }
  0xc9   : > { %v865_v28 = vpop.permute.xlu0 %864  ;;  %v790_v32 = vpop.permute.xlu1 %789 }
  0xca   : > { %v931_v31 = vsel %vm905_vm5, %v898_v27, %v865_v28  ;;  %v904_v13 = vsel %vm872_vm4, %v3637_v42, %v790_v32 }
  0xcb   : > { %2953 = vmatprep.mubr.msk.bf16.mxu0 %vm945_vm6, %v931_v31 }
  0xcc   : > { %2954 = vmatmul.mubr.msk.bf16.gmra.mrb[24].mxu0 %vm945_vm6, %v933_v33  ;;  %2988 = vmatmul.mubr.msk.bf16.gmra.mrb[24].mxu1 %vm945_vm6, %v3793_v3 }
  0xcd   : > { %v788_v34 = vpop.permute.xlu0 %787  ;;  %2991 = vmatprep.mubr.msk.bf16.mxu1 %vm3385_vm3, %v3382_v1  ;;  %v871_v23 = vpop.permute.xlu1 %870 }
  0xce   : > { %v902_v37 = vsel %vm872_vm4, %v3651_v52, %v788_v34  ;;  %v937_v40 = vsel %vm905_vm5, %v904_v13, %v871_v23 }
  0xd1   : > { %v869_v38 = vpop.permute.xlu0 %868  ;;  %v1460_v52 = vpop.permute.xlu1 %1459 }
  0xd2   : > { %v935_v39 = vsel %vm905_vm5, %v902_v37, %v869_v38 }
  0xd3   : > { %2957 = vmatprep.mubr.msk.bf16.mxu0 %vm945_vm6, %v935_v39 }
  0xd4   : > { %2958 = vmatmul.mubr.msk.bf16.gmra.mrb[28].mxu0 %vm945_vm6, %v937_v40  ;;  %2992 = vmatmul.mubr.msk.bf16.gmra.mrb[28].mxu1 %vm945_vm6, %v3808_v11 }
  0xd5   : > { %v1455_v41 = vpop.permute.xlu0 %1454  ;;  %2995 = vmatprep.mubr.msk.bf16.mxu1 %vm3385_vm3, %v3382_v1  ;;  %3025 = vmatprep.mubr.msk.bf16.mxu0 %vm3385_vm3, %v3382_v1  ;;  %v1815_v10 = vpop.permute.xlu1 %1814 }
  0xd6   : > { %v1462_v42 = vsel %vm872_vm4, %v3676_v19, %v1455_v41  ;;  %v1829_v48 = vsel %vm872_vm4, %v3682_v25, %v1815_v10 }
  0xd7   : > { %v1464_v43 = vsel %vm905_vm5, %v1462_v42, %v1460_v52 }
  0xd9   : > { %v1813_v19 = vpop.permute.xlu0 %1812 }
  0xda   : > { %v1827_v4 = vsel %vm872_vm4, %v3691_v36, %v1813_v19 }
  0xdc   : > { %2996 = vmatmul.mubr.msk.bf16.gmra.mrb[32].mxu1 %vm945_vm6, %v3811_v14  ;;  %3026 = vmatmul.mubr.msk.bf16.vlgmr.msra.gmra.mrb[32].mxu0 %vm945_vm6, %v1464_v43 }
  0xdd   : > { %3030 = vmatpush3.bf16.msra.mxu0 %v1531_v6  ;;  %3031 = vmatprep.mubr.msk.bf16.mxu0 %vm945_vm6, %v3754_v49  ;;  %v1823_v46 = vpop.permute.xlu0 %1822  ;;  %v1825_v49 = vpop.permute.xlu1 %1824 }
  0xde   : > { %2999 = vmatprep.mubr.msk.bf16.mxu1 %vm3385_vm3, %v3382_v1  ;;  %v1831_v47 = vsel %vm905_vm5, %v1827_v4, %v1823_v46 }
  0xe4   : > { %3000 = vmatmul.mubr.msk.bf16.gmra.mrb[36].mxu1 %vm945_vm6, %v927_v20  ;;  %3032 = vmatmul.mubr.msk.bf16.vlgmr.msra.gmra.mrb[36].mxu0 %vm945_vm6, %v3757_v51 }
  0xe5   : > { %3035 = vmatprep.mubr.msk.bf16.mxu0 %vm945_vm6, %v3772_v57  ;;  %3003 = vmatprep.mubr.msk.bf16.mxu1 %vm3385_vm3, %v3382_v1 }
  0xec   : > { %3004 = vmatmul.mubr.msk.bf16.gmra.mrb[40].mxu1 %vm945_vm6, %v929_v24  ;;  %3036 = vmatmul.mubr.msk.bf16.gmra.mrb[40].mxu0 %vm945_vm6, %v3775_v59 }
  0xed   : > { %3039 = vmatprep.mubr.msk.bf16.mxu0 %vm945_vm6, %v3790_v0  ;;  %3007 = vmatprep.mubr.msk.bf16.mxu1 %vm3385_vm3, %v3382_v1 }
  0xf4   : > { %3008 = vmatmul.mubr.msk.bf16.gmra.mrb[44].mxu1 %vm945_vm6, %v931_v31  ;;  %3040 = vmatmul.mubr.msk.bf16.gmra.mrb[44].mxu0 %vm945_vm6, %v3793_v3 }
  0xf5   : > { %3043 = vmatprep.mubr.msk.bf16.mxu0 %vm945_vm6, %v3808_v11  ;;  %3011 = vmatprep.mubr.msk.bf16.mxu1 %vm3385_vm3, %v3382_v1 }
  0xfc   : > { %3012 = vmatmul.mubr.msk.bf16.gmra.mrb[48].mxu1 %vm945_vm6, %v933_v33  ;;  %3044 = vmatmul.mubr.msk.bf16.gmra.mrb[48].mxu0 %vm945_vm6, %v3811_v14 }
  0xfd   : > { %3047 = vmatprep.mubr.msk.bf16.mxu0 %vm945_vm6, %v927_v20  ;;  %3015 = vmatprep.mubr.msk.bf16.mxu1 %vm3385_vm3, %v3382_v1 }
 0x104   : > { %3016 = vmatmul.mubr.msk.bf16.gmra.mrb[52].mxu1 %vm945_vm6, %v935_v39  ;;  %3048 = vmatmul.mubr.msk.bf16.gmra.mrb[52].mxu0 %vm945_vm6, %v929_v24 }
 0x105   : > { %3051 = vmatprep.mubr.msk.bf16.mxu0 %vm945_vm6, %v931_v31  ;;  %3019 = vmatprep.mubr.msk.bf16.mxu1 %vm3385_vm3, %v3382_v1  ;;  %v1833_v1 = vsel %vm905_vm5, %v1829_v48, %v1825_v49 }
 0x10c   : > { %3020 = vmatmul.mubr.msk.bf16.gmra.mrb[56].mxu1 %vm945_vm6, %v937_v40  ;;  %3052 = vmatmul.mubr.msk.bf16.gmra.mrb[56].mxu0 %vm945_vm6, %v933_v33 }
 0x10d   : > { %3055 = vmatprep.mubr.msk.bf16.mxu0 %vm945_vm6, %v935_v39  ;;  %3061 = vmatprep.mubr.msk.bf16.mxu1 %vm945_vm6, %v1831_v47 }
 0x114   : > { %3056 = vmatmul.mubr.msk.bf16.gmra.mrb[60].mxu0 %vm945_vm6, %v937_v40  ;;  %3062 = vmatmul.mubr.msk.bf16.vlgmr.msra.gmra.mrb[60].mxu1 %vm945_vm6, %v1833_v1 }
 0x16f   : > { %v2931_v36 = vpop.f32.mrb[0].mxu0  ;;  %v1220_v50 = vpop.f32.mrb[0].mxu1 }
 0x170   : > { %v1016_v51 = vpop.f32.mrb[1].mxu0  ;;  %v2965_v22 = vpop.f32.mrb[1].mxu1 }
 0x171   : > { %v3915_v30 = vadd.f32 %v1220_v50, %v1016_v51  ;;  %v2932_v54 = vpop.f32.mrb[2].mxu0  ;;  %v1223_v55 = vpop.f32.mrb[2].mxu1 }
 0x172   : > { %v1019_v56 = vpop.f32.mrb[3].mxu0  ;;  %v2966_v57 = vpop.f32.mrb[3].mxu1 }
 0x173   : > { %v3917_v58 = vadd.f32 %v1223_v55, %v1019_v56 }
 0x177   : > { %v2935_v25 = vpop.f32.mrb[4].mxu0  ;;  %v1228_v59 = vpop.f32.mrb[4].mxu1 }
 0x178   : > { %v3919_v35 = vadd.f32 %v2931_v36, %v1228_v59  ;;  %v1032_v44 = vpop.f32.mrb[5].mxu0  ;;  %v2969_v60 = vpop.f32.mrb[5].mxu1 }
 0x179   : > { %v2936_v61 = vpop.f32.mrb[6].mxu0  ;;  %v1231_v63 = vpop.f32.mrb[6].mxu1 }
 0x17a   : > { %v3921_v0 = vadd.f32 %v2932_v54, %v1231_v63  ;;  %v1035_v2 = vpop.f32.mrb[7].mxu0  ;;  %v2970_v3 = vpop.f32.mrb[7].mxu1 }
 0x17f   : > { %v2939_v62 = vpop.f32.mrb[8].mxu0  ;;  %v1236_v5 = vpop.f32.mrb[8].mxu1 }
 0x180   : > { %v3923_v7 = vadd.f32 %v1236_v5, %v1032_v44  ;;  %v1048_v8 = vpop.f32.mrb[9].mxu0  ;;  %v2973_v9 = vpop.f32.mrb[9].mxu1 }
 0x181   : > { %v2940_v11 = vpop.f32.mrb[10].mxu0  ;;  %v1239_v12 = vpop.f32.mrb[10].mxu1 }
 0x182   : > { %v3925_v14 = vadd.f32 %v1239_v12, %v1035_v2  ;;  %v1051_v17 = vpop.f32.mrb[11].mxu0  ;;  %v2974_v29 = vpop.f32.mrb[11].mxu1 }
 0x187   : > { %v2943_v15 = vpop.f32.mrb[12].mxu0  ;;  %v1244_v16 = vpop.f32.mrb[12].mxu1 }
 0x188   : > { %v3927_v18 = vadd.f32 %v2935_v25, %v1244_v16  ;;  %v1064_v20 = vpop.f32.mrb[13].mxu0  ;;  %v2977_v21 = vpop.f32.mrb[13].mxu1 }
 0x189   : > { %v2944_v24 = vpop.f32.mrb[14].mxu0  ;;  %v1247_v26 = vpop.f32.mrb[14].mxu1 }
 0x18a   : > { %v3929_v45 = vadd.f32 %v2936_v61, %v1247_v26  ;;  %v1067_v53 = vpop.f32.mrb[15].mxu0  ;;  %v2978_v27 = vpop.f32.mrb[15].mxu1 }
 0x18f   : > { %v2947_v28 = vpop.f32.mrb[16].mxu0  ;;  %v1252_v31 = vpop.f32.mrb[16].mxu1 }
 0x190   : > { %v3931_v32 = vadd.f32 %v1252_v31, %v1048_v8  ;;  %v1080_v33 = vpop.f32.mrb[17].mxu0  ;;  %v2981_v34 = vpop.f32.mrb[17].mxu1 }
 0x191   : > { %v2948_v13 = vpop.f32.mrb[18].mxu0  ;;  %v1255_v23 = vpop.f32.mrb[18].mxu1 }
 0x192   : > { %v3933_v37 = vadd.f32 %v1255_v23, %v1051_v17  ;;  %v1083_v38 = vpop.f32.mrb[19].mxu0  ;;  %v2982_v39 = vpop.f32.mrb[19].mxu1  ;;  %v3986_v23 = vld [vmem:[%s4335_s4] ss:$0 sm:$0xff] }
 0x197   : > { %v3935_v40 = vpop.f32.mrb[20].mxu0  ;;  %v1260_v41 = vpop.f32.mrb[20].mxu1 }
 0x198   : > { %v3937_v42 = vadd.f32 %v2939_v62, %v1260_v41  ;;  %v3939_v52 = vpop.f32.mrb[21].mxu0  ;;  %v2985_v43 = vpop.f32.mrb[21].mxu1 }
 0x199   : > { %v3941_v6 = vpop.f32.mrb[22].mxu0  ;;  %v1263_v19 = vpop.f32.mrb[22].mxu1 }
 0x19a   : > { %v3943_v4 = vadd.f32 %v2940_v11, %v1263_v19  ;;  %v3945_v46 = vpop.f32.mrb[23].mxu0  ;;  %v2986_v10 = vpop.f32.mrb[23].mxu1 }
 0x19f   : > { %v3947_v47 = vpop.f32.mrb[24].mxu0  ;;  %v1268_v48 = vpop.f32.mrb[24].mxu1 }
 0x1a0   : > { %v3949_v49 = vadd.f32 %v1268_v48, %v1064_v20  ;;  %v3951_v1 = vpop.f32.mrb[25].mxu0  ;;  %v2989_v36 = vpop.f32.mrb[25].mxu1 }
 0x1a1   : > { %v3953_v50 = vpop.f32.mrb[26].mxu0  ;;  %v1271_v51 = vpop.f32.mrb[26].mxu1 }
 0x1a2   : > { %v3955_v22 = vadd.f32 %v1271_v51, %v1067_v53  ;;  %v3957_v54 = vpop.f32.mrb[27].mxu0  ;;  %v2990_v55 = vpop.f32.mrb[27].mxu1  ;;  %v3978_v53 = vld [vmem:[%s4334_s3] ss:$0 sm:$0xff] }
 0x1a7   : > { %v2959_v56 = vpop.f32.mrb[28].mxu0  ;;  %v1276_v57 = vpop.f32.mrb[28].mxu1 }
 0x1a8   : > { %v3959_v25 = vadd.f32 %v2943_v15, %v1276_v57  ;;  %v3961_v59 = vpop.f32.mrb[29].mxu0  ;;  %v2993_v44 = vpop.f32.mrb[29].mxu1 }
 0x1a9   : > { %v2960_v60 = vpop.f32.mrb[30].mxu0  ;;  %v1279_v61 = vpop.f32.mrb[30].mxu1 }
 0x1aa   : > { %v3963_v63 = vadd.f32 %v2944_v24, %v1279_v61  ;;  %v3965_v2 = vpop.f32.mrb[31].mxu0  ;;  %v2994_v3 = vpop.f32.mrb[31].mxu1 }
 0x1af   : > { %v1284_v62 = vpop.f32.mrb[32].mxu1  ;;  %v1511_v5 = vpop.f32.mrb[32].mxu0 }
 0x1b0   : > { %v3967_v8 = vadd.f32 %v1284_v62, %v1080_v33  ;;  %v3969_v9 = vadd.f32 %v2959_v56, %v1511_v5  ;;  %v2997_v11 = vpop.f32.mrb[33].mxu1  ;;  %v3027_v12 = vpop.f32.mrb[33].mxu0 }
 0x1b1   : > { %v1287_v17 = vpop.f32.mrb[34].mxu1  ;;  %v1514_v29 = vpop.f32.mrb[34].mxu0 }
 0x1b2   : > { %v3971_v15 = vadd.f32 %v1287_v17, %v1083_v38  ;;  %v3973_v16 = vadd.f32 %v2960_v60, %v1514_v29  ;;  %v2998_v20 = vpop.f32.mrb[35].mxu1  ;;  %v3028_v21 = vpop.f32.mrb[35].mxu0 }
 0x1b7   : > { %v1292_v24 = vpop.f32.mrb[36].mxu1  ;;  %v3033_v26 = vpop.f32.mrb[36].mxu0 }
 0x1b8   : > { %v3980_v27 = vadd.f32 %v2947_v28, %v1292_v24  ;;  %v1708_v31 = vadd.f32 %v3033_v26, %v3919_v35  ;;  %v3001_v33 = vpop.f32.mrb[37].mxu1  ;;  %v1567_v34 = vpop.f32.mrb[37].mxu0 }
 0x1b9   : > { %v1706_v38 = vadd.f32 %v1567_v34, %v3915_v30  ;;  %v1295_v39 = vpop.f32.mrb[38].mxu1  ;;  %v3034_v41 = vpop.f32.mrb[38].mxu0 }
 0x1ba   : > { %v1946_v43 = vmul.f32 %v3978_v53, %v1708_v31  ;;  %v3990_v19 = vadd.f32 %v2948_v13, %v1295_v39  ;;  %v1709_v28 = vadd.f32 %v3034_v41, %v3921_v0  ;;  %v3002_v10 = vpop.f32.mrb[39].mxu1  ;;  %v1570_v48 = vpop.f32.mrb[39].mxu0 }
 0x1bb   : > { %v1944_v35 = vmul.f32 %v3978_v53, %v1706_v38  ;;  %v1707_v36 = vadd.f32 %v1570_v48, %v3917_v58 }
 0x1bc   : > { %v3996_v51 = vadd.f32 %v3986_v23, %v1946_v43  ;;  %v1947_v55 = vmul.f32 %v3978_v53, %v1709_v28 }
 0x1bd   : > { %v4000_v30 = vadd.f32 %v3986_v23, %v1944_v35  ;;  %v1945_v56 = vmul.f32 %v3978_v53, %v1707_v36 }
 0x1be   : > { %v2677_v13 = vmul.f32 -1.442695, %v3996_v51  ;;  %v4005_v0 = vadd.f32 %v3986_v23, %v1947_v55 }
 0x1bf   : > { %v2675_v57 = vmul.f32 -1.442695, %v4000_v30  ;;  %v4009_v44 = vadd.f32 %v3986_v23, %v1945_v56  ;;  %v1300_v58 = vpop.f32.mrb[40].mxu1  ;;  %v3037_v60 = vpop.f32.mrb[40].mxu0 }
 0x1c0   : > { %3174 = vpow2.f32 %v2677_v13  ;;  %v2678_v61 = vmul.f32 -1.442695, %v4005_v0  ;;  %v4013_v3 = vadd.f32 %v1300_v58, %v3939_v52  ;;  %v1712_v62 = vadd.f32 %v3037_v60, %v3927_v18  ;;  %v3005_v5 = vpop.f32.mrb[41].mxu1  ;;  %v1583_v11 = vpop.f32.mrb[41].mxu0 }
 0x1c1   : > { %3176 = vpow2.f32 %v2675_v57  ;;  %v2676_v12 = vmul.f32 -1.442695, %v4009_v44  ;;  %v1710_v17 = vadd.f32 %v1583_v11, %v3923_v7  ;;  %v1303_v29 = vpop.f32.mrb[42].mxu1  ;;  %v3038_v20 = vpop.f32.mrb[42].mxu0 }
 0x1c2   : > { %3178 = vpow2.f32 %v2678_v61  ;;  %v1950_v21 = vmul.f32 %v3978_v53, %v1712_v62  ;;  %v4020_v24 = vadd.f32 %v1303_v29, %v3945_v46  ;;  %v1713_v52 = vadd.f32 %v3038_v20, %v3929_v45  ;;  %v3006_v26 = vpop.f32.mrb[43].mxu1  ;;  %v1586_v31 = vpop.f32.mrb[43].mxu0 }
 0x1c3   : > { %3180 = vpow2.f32 %v2676_v12  ;;  %v1948_v18 = vmul.f32 %v3978_v53, %v1710_v17  ;;  %v1711_v33 = vadd.f32 %v1586_v31, %v3925_v14 }
 0x1c4   : > { %v4026_v34 = vadd.f32 %v3986_v23, %v1950_v21  ;;  %v1951_v7 = vmul.f32 %v3978_v53, %v1713_v52 }
 0x1c5   : > { %v4030_v38 = vadd.f32 %v3986_v23, %v1948_v18  ;;  %v1949_v46 = vmul.f32 %v3978_v53, %v1711_v33 }
 0x1c6   : > { %v2681_v39 = vmul.f32 -1.442695, %v4026_v34  ;;  %v4035_v45 = vadd.f32 %v3986_v23, %v1951_v7 }
 0x1c7   : > { %v2679_v41 = vmul.f32 -1.442695, %v4030_v38  ;;  %v4039_v43 = vadd.f32 %v3986_v23, %v1949_v46  ;;  %v1308_v14 = vpop.f32.mrb[44].mxu1  ;;  %v3041_v28 = vpop.f32.mrb[44].mxu0 }
 0x1c8   : > { %3182 = vpow2.f32 %v2681_v39  ;;  %v2682_v10 = vmul.f32 -1.442695, %v4035_v45  ;;  %v4043_v48 = vadd.f32 %v3935_v40, %v1308_v14  ;;  %v1716_v35 = vadd.f32 %v3041_v28, %v3937_v42  ;;  %v3009_v36 = vpop.f32.mrb[45].mxu1  ;;  %v1599_v55 = vpop.f32.mrb[45].mxu0 }
 0x1c9   : > { %3184 = vpow2.f32 %v2679_v41  ;;  %v2680_v56 = vmul.f32 -1.442695, %v4039_v43  ;;  %v1714_v13 = vadd.f32 %v1599_v55, %v3931_v32  ;;  %v1311_v57 = vpop.f32.mrb[46].mxu1  ;;  %v3042_v58 = vpop.f32.mrb[46].mxu0 }
 0x1ca   : > { %v3175_v60 = vpop.eup %3174  ;;  %3186 = vpow2.f32 %v2682_v10  ;;  %v1954_v61 = vmul.f32 %v3978_v53, %v1716_v35  ;;  %v4050_v62 = vadd.f32 %v3941_v6, %v1311_v57  ;;  %v1717_v40 = vadd.f32 %v3042_v58, %v3943_v4  ;;  %v3010_v5 = vpop.f32.mrb[47].mxu1 }
 0x1cb   : > { %v1602_v42 = vpop.f32.mrb[47].mxu0  ;;  %v3177_v11 = vpop.eup %3176  ;;  %v2113_v12 = vadd.f32 1.0, %v3175_v60  ;;  %3188 = vpow2.f32 %v2680_v56  ;;  %v1952_v17 = vmul.f32 %v3978_v53, %v1714_v13 }
 0x1cc   : > { %v1715_v32 = vadd.f32 %v1602_v42, %v3933_v37  ;;  %v3179_v29 = vpop.eup %3178  ;;  %v2111_v20 = vadd.f32 1.0, %v3177_v11  ;;  %v4056_v21 = vadd.f32 %v3986_v23, %v1954_v61  ;;  %v1955_v52 = vmul.f32 %v3978_v53, %v1717_v40 }
 0x1cd   : > { %v3181_v6 = vpop.eup %3180  ;;  %3190 = vrcp.f32 %v2113_v12  ;;  %v2114_v26 = vadd.f32 1.0, %v3179_v29  ;;  %v4060_v4 = vadd.f32 %v3986_v23, %v1952_v17 }
 0x1ce   : > { %v1953_v31 = vmul.f32 %v3978_v53, %v1715_v32  ;;  %3192 = vrcp.f32 %v2111_v20  ;;  %v2112_v18 = vadd.f32 1.0, %v3181_v6  ;;  %v2685_v33 = vmul.f32 -1.442695, %v4056_v21 }
 0x1cf   : > { %v4065_v37 = vadd.f32 %v3986_v23, %v1955_v52  ;;  %3194 = vrcp.f32 %v2114_v26  ;;  %v2683_v7 = vmul.f32 -1.442695, %v4060_v4  ;;  %v1316_v39 = vpop.f32.mrb[48].mxu1  ;;  %v3045_v41 = vpop.f32.mrb[48].mxu0 }
 0x1d0   : > { %v4069_v46 = vadd.f32 %v3986_v23, %v1953_v31  ;;  %3196 = vrcp.f32 %v2112_v18  ;;  %v4073_v28 = vadd.f32 %v1316_v39, %v3951_v1  ;;  %v1720_v10 = vadd.f32 %v3045_v41, %v3959_v25  ;;  %v3013_v35 = vpop.f32.mrb[49].mxu1  ;;  %v1615_v36 = vpop.f32.mrb[49].mxu0 }
 0x1d1   : > { %v2686_v14 = vmul.f32 -1.442695, %v4065_v37  ;;  %3198 = vpow2.f32 %v2685_v33  ;;  %v1718_v56 = vadd.f32 %v1615_v36, %v3949_v49  ;;  %v1319_v13 = vpop.f32.mrb[50].mxu1  ;;  %v3046_v57 = vpop.f32.mrb[50].mxu0 }
 0x1d2   : > { %v2684_v55 = vmul.f32 -1.442695, %v4069_v46  ;;  %v3183_v58 = vpop.eup %3182  ;;  %3200 = vpow2.f32 %v2683_v7  ;;  %v1958_v60 = vmul.f32 %v3978_v53, %v1720_v10  ;;  %v4080_v61 = vadd.f32 %v1319_v13, %v3957_v54  ;;  %v3014_v25 = vpop.f32.mrb[51].mxu1 }
 0x1d3   : > { %v1721_v1 = vadd.f32 %v3046_v57, %v3963_v63  ;;  %v1618_v40 = vpop.f32.mrb[51].mxu0  ;;  %v3185_v5 = vpop.eup %3184  ;;  %v2117_v42 = vadd.f32 1.0, %v3183_v58  ;;  %3202 = vpow2.f32 %v2686_v14  ;;  %v1956_v11 = vmul.f32 %v3978_v53, %v1718_v56 }
 0x1d4   : > { %v1719_v49 = vadd.f32 %v1618_v40, %v3955_v22  ;;  %v3187_v12 = vpop.eup %3186  ;;  %v2115_v17 = vadd.f32 1.0, %v3185_v5  ;;  %3204 = vpow2.f32 %v2684_v55  ;;  %v4086_v32 = vadd.f32 %v3986_v23, %v1958_v60 }
 0x1d5   : > { %v1959_v54 = vmul.f32 %v3978_v53, %v1721_v1  ;;  %v3189_v29 = vpop.eup %3188  ;;  %3206 = vrcp.f32 %v2117_v42  ;;  %v2118_v63 = vadd.f32 1.0, %v3187_v12  ;;  %v4091_v20 = vadd.f32 %v3986_v23, %v1956_v11 }
 0x1d6   : > { %v1957_v52 = vmul.f32 %v3978_v53, %v1719_v49  ;;  %3208 = vrcp.f32 %v2115_v17  ;;  %v2116_v22 = vadd.f32 1.0, %v3189_v29  ;;  %v2689_v6 = vmul.f32 -1.442695, %v4086_v32 }
 0x1d7   : > { %v4096_v26 = vadd.f32 %v3986_v23, %v1959_v54  ;;  %v3191_v31 = vpop.eup %3190  ;;  %3210 = vrcp.f32 %v2118_v63  ;;  %v2687_v18 = vmul.f32 -1.442695, %v4091_v20  ;;  %v1324_v7 = vpop.f32.mrb[52].mxu1 }
 0x1d8   : > { %v4100_v33 = vadd.f32 %v3986_v23, %v1957_v52  ;;  %v3049_v39 = vpop.f32.mrb[52].mxu0  ;;  %v3193_v41 = vpop.eup %3192  ;;  %v2209_v14 = vmul.f32 %v3191_v31, %v3996_v51  ;;  %3212 = vrcp.f32 %v2116_v22  ;;  %v4109_v35 = vadd.f32 %v3947_v47, %v1324_v7 }
 0x1d9   : > { %v2690_v10 = vmul.f32 -1.442695, %v4096_v26  ;;  %v3017_v36 = vpop.f32.mrb[53].mxu1  ;;  %v1631_v55 = vpop.f32.mrb[53].mxu0  ;;  %v2207_v13 = vmul.f32 %v3193_v41, %v4000_v30  ;;  %3214 = vpow2.f32 %v2689_v6  ;;  %v1724_v58 = vadd.f32 %v3049_v39, %v3980_v27 }
 0x1da   : > { %v3195_v56 = vpop.eup %3194  ;;  %v2688_v57 = vmul.f32 -1.442695, %v4100_v33  ;;  %v1327_v51 = vpop.f32.mrb[54].mxu1  ;;  %3216 = vpow2.f32 %v2687_v18  ;;  %v1722_v40 = vadd.f32 %v1631_v55, %v3967_v8 }
 0x1db   : > { %v3050_v60 = vpop.f32.mrb[54].mxu0  ;;  %v3197_v1 = vpop.eup %3196  ;;  %v2210_v25 = vmul.f32 %v3195_v56, %v4005_v0  ;;  %v4117_v47 = vadd.f32 %v3953_v50, %v1327_v51  ;;  %3218 = vpow2.f32 %v2690_v10  ;;  %v1962_v27 = vmul.f32 %v3978_v53, %v1724_v58 }
 0x1dc   : > { %v3018_v5 = vpop.f32.mrb[55].mxu1  ;;  %v1634_v42 = vpop.f32.mrb[55].mxu0  ;;  %v2208_v30 = vmul.f32 %v3197_v1, %v4009_v44  ;;  %v1725_v49 = vadd.f32 %v3050_v60, %v3990_v19  ;;  %3220 = vpow2.f32 %v2688_v57  ;;  %v1960_v8 = vmul.f32 %v3978_v53, %v1722_v40 }
 0x1dd   : > { %v3199_v11 = vpop.eup %3198  ;;  %v2787_v17 = vpack.c.bf16 %v2210_v25, %v2209_v14  ;;  %v4124_v63 = vadd.f32 %v3986_v23, %v1962_v27  ;;  %v1723_v6 = vadd.f32 %v1634_v42, %v3971_v15 }
 0x1de   : > { %v3201_v12 = vpop.eup %3200  ;;  %v2121_v0 = vadd.f32 1.0, %v3199_v11  ;;  %v2782_v50 = vpack.c.bf16 %v2208_v30, %v2207_v13  ;;  %v1963_v52 = vmul.f32 %v3978_v53, %v1725_v49  ;;  %v4132_v22 = vadd.f32 %v3986_v23, %v1960_v8 }
 0x1df   : > { %v3203_v54 = vpop.eup %3202  ;;  %v2119_v29 = vadd.f32 1.0, %v3201_v12  ;;  %2859 = vst [vmem:[%s4128_s27 + $0x8] sm:$0xff] %v2787_v17   ;;  %v2693_v7 = vmul.f32 -1.442695, %v4124_v63  ;;  %v1332_v41 = vpop.f32.mrb[56].mxu1  ;;  %v1961_v56 = vmul.f32 %v3978_v53, %v1723_v6 }
 0x1e0   : > { %v3205_v44 = vpop.eup %3204  ;;  %3222 = vrcp.f32 %v2121_v0  ;;  %v2122_v19 = vadd.f32 1.0, %v3203_v54  ;;  %2783 = vst [vmem:[%s4128_s27] sm:$0xff] %v2782_v50   ;;  %v4138_v39 = vadd.f32 %v3986_v23, %v1963_v52  ;;  %v3053_v14 = vpop.f32.mrb[56].mxu0  ;;  %v2691_v55 = vmul.f32 -1.442695, %v4132_v22 }
 0x1e1   : > { %v3207_v31 = vpop.eup %3206  ;;  %3224 = vrcp.f32 %v2119_v29  ;;  %v2120_v18 = vadd.f32 1.0, %v3205_v44  ;;  %v3021_v15 = vpop.f32.mrb[57].mxu1  ;;  %v4146_v60 = vadd.f32 %v1332_v41, %v3961_v59  ;;  %v4150_v5 = vadd.f32 %v3986_v23, %v1961_v56 }
 0x1e2   : > { %v3209_v10 = vpop.eup %3208  ;;  %v2213_v36 = vmul.f32 %v3207_v31, %v4026_v34  ;;  %3226 = vrcp.f32 %v2122_v19  ;;  %v1647_v13 = vpop.f32.mrb[57].mxu0  ;;  %v2694_v51 = vmul.f32 -1.442695, %v4138_v39  ;;  %v1728_v42 = vadd.f32 %v3053_v14, %v4043_v48 }
 0x1e3   : > { %v3211_v57 = vpop.eup %3210  ;;  %v2211_v58 = vmul.f32 %v3209_v10, %v4030_v38  ;;  %3228 = vrcp.f32 %v2120_v18  ;;  %v1335_v1 = vpop.f32.mrb[58].mxu1  ;;  %v1726_v59 = vadd.f32 %v1647_v13, %v4013_v3  ;;  %v2692_v0 = vmul.f32 -1.442695, %v4150_v5 }
 0x1e4   : > { %v3054_v25 = vpop.f32.mrb[58].mxu0  ;;  %v3213_v40 = vpop.eup %3212  ;;  %v2214_v34 = vmul.f32 %v3211_v57, %v4035_v45  ;;  %3230 = vpow2.f32 %v2693_v7  ;;  %v4156_v49 = vadd.f32 %v1335_v1, %v3965_v2  ;;  %v1966_v50 = vmul.f32 %v3978_v53, %v1728_v42 }
 0x1e5   : > { %v3022_v11 = vpop.f32.mrb[59].mxu1  ;;  %v1650_v30 = vpop.f32.mrb[59].mxu0  ;;  %v2212_v27 = vmul.f32 %v3213_v40, %v4039_v43  ;;  %3232 = vpow2.f32 %v2691_v55  ;;  %v1964_v43 = vmul.f32 %v3978_v53, %v1726_v59  ;;  %v1729_v2 = vadd.f32 %v3054_v25, %v4050_v62 }
 0x1e6   : > { %v3215_v38 = vpop.eup %3214  ;;  %v2797_v45 = vpack.c.bf16 %v2214_v34, %v2213_v36  ;;  %3234 = vpow2.f32 %v2694_v51  ;;  %v1727_v52 = vadd.f32 %v1650_v30, %v4020_v24  ;;  %v4166_v19 = vadd.f32 %v3986_v23, %v1966_v50 }
 0x1e7   : > { %v3217_v12 = vpop.eup %3216  ;;  %v2125_v17 = vadd.f32 1.0, %v3215_v38  ;;  %v2792_v8 = vpack.c.bf16 %v2212_v27, %v2211_v58  ;;  %v4169_v6 = vadd.f32 %v3986_v23, %v1964_v43  ;;  %v3057_v31 = vpop.f32.mrb[60].mxu0  ;;  %v1967_v41 = vmul.f32 %v3978_v53, %v1729_v2 }
 0x1e8   : > { %v3219_v48 = vpop.eup %3218  ;;  %v2123_v54 = vadd.f32 1.0, %v3217_v12  ;;  %2861 = vst [vmem:[%s4128_s27 + $0x18] sm:$0xff] %v2797_v45   ;;  %v3063_v18 = vpop.f32.mrb[60].mxu1  ;;  %v1965_v14 = vmul.f32 %v3978_v53, %v1727_v52  ;;  %v1732_v62 = vadd.f32 %v3057_v31, %v4109_v35  ;;  %v2697_v56 = vmul.f32 -1.442695, %v4166_v19 }
 0x1e9   : > { %v3221_v29 = vpop.eup %3220  ;;  %3236 = vrcp.f32 %v2125_v17  ;;  %v2126_v3 = vadd.f32 1.0, %v3219_v48  ;;  %2860 = vst [vmem:[%s4128_s27 + $0x10] sm:$0xff] %v2792_v8   ;;  %v1663_v24 = vpop.f32.mrb[61].mxu0  ;;  %v2695_v15 = vmul.f32 -1.442695, %v4169_v6  ;;  %v4179_v1 = vadd.f32 %v3986_v23, %v1967_v41 }
 0x1ea   : > { %3238 = vrcp.f32 %v2123_v54  ;;  %v2124_v44 = vadd.f32 1.0, %v3221_v29  ;;  %v3223_v7 = vpop.eup %3222  ;;  %v1882_v10 = vpop.f32.mrb[61].mxu1  ;;  %v4182_v35 = vadd.f32 %v3986_v23, %v1965_v14  ;;  %v1970_v42 = vmul.f32 %v3978_v53, %v1732_v62 }
 0x1eb   : > { %3240 = vrcp.f32 %v2126_v3  ;;  %v3225_v36 = vpop.eup %3224  ;;  %v2217_v55 = vmul.f32 %v3223_v7, %v4056_v21  ;;  %v3058_v13 = vpop.f32.mrb[62].mxu0  ;;  %v1899_v11 = vadd.f32 %v3063_v18, %v3969_v9  ;;  %v2698_v38 = vmul.f32 -1.442695, %v4179_v1 }
 0x1ec   : > { %3242 = vrcp.f32 %v2124_v44  ;;  %v3064_v57 = vpop.f32.mrb[62].mxu1  ;;  %v3227_v58 = vpop.eup %3226  ;;  %v2215_v51 = vmul.f32 %v3225_v36, %v4060_v4  ;;  %v2696_v27 = vmul.f32 -1.442695, %v4182_v35  ;;  %v1897_v3 = vadd.f32 %v1882_v10, %v4146_v60 }
 0x1ed   : > { %3244 = vpow2.f32 %v2692_v0  ;;  %v4184_v25 = vpop.f32.mrb[63].mxu0  ;;  %v4186_v21 = vpop.f32.mrb[63].mxu1  ;;  %v2218_v34 = vmul.f32 %v3227_v58, %v4065_v37  ;;  %v4195_v37 = vadd.f32 %v3986_v23, %v1970_v42  ;;  %v1974_v17 = vmul.f32 %v3978_v53, %v1899_v11 }
 0x1ee   : > { %v3229_v40 = vpop.eup %3228  ;;  %3246 = vpow2.f32 %v2697_v56  ;;  %v1733_v2 = vadd.f32 %v3058_v13, %v4117_v47  ;;  %v1900_v31 = vadd.f32 %v3064_v57, %v3973_v16  ;;  %v1972_v14 = vmul.f32 %v3978_v53, %v1897_v3 }
 0x1ef   : > { %v3231_v4 = vpop.eup %3230  ;;  %v2216_v30 = vmul.f32 %v3229_v40, %v4069_v46  ;;  %3248 = vpow2.f32 %v2695_v15  ;;  %v2807_v12 = vpack.c.bf16 %v2218_v34, %v2217_v55  ;;  %v1730_v46 = vadd.f32 %v1663_v24, %v4073_v28 }
 0x1f0   : > { %v3233_v59 = vpop.eup %3232  ;;  %v2129_v45 = vadd.f32 1.0, %v3231_v4  ;;  %3250 = vpow2.f32 %v2698_v38  ;;  %v2701_v54 = vmul.f32 -1.442695, %v4195_v37  ;;  %v4202_v50 = vadd.f32 %v3986_v23, %v1974_v17 }
 0x1f1   : > { %v3235_v0 = vpop.eup %3234  ;;  %v2802_v9 = vpack.c.bf16 %v2216_v30, %v2215_v51  ;;  %v2127_v48 = vadd.f32 1.0, %v3233_v59  ;;  %2863 = vst [vmem:[%s4128_s27 + $0x28] sm:$0xff] %v2807_v12   ;;  %v1968_v29 = vmul.f32 %v3978_v53, %v1730_v46  ;;  %v1975_v62 = vmul.f32 %v3978_v53, %v1900_v31 }
 0x1f2   : > { %3252 = vrcp.f32 %v2129_v45  ;;  %v2130_v8 = vadd.f32 1.0, %v3235_v0  ;;  %v2705_v44 = vmul.f32 -1.442695, %v4202_v50  ;;  %v4222_v10 = vadd.f32 %v3986_v23, %v1972_v14 }
 0x1f3   : > { %v3237_v43 = vpop.eup %3236  ;;  %2862 = vst [vmem:[%s4128_s27 + $0x20] sm:$0xff] %v2802_v9   ;;  %3254 = vrcp.f32 %v2127_v48  ;;  %v4213_v41 = vadd.f32 %v3986_v23, %v1968_v29  ;;  %v4228_v15 = vadd.f32 %v3986_v23, %v1975_v62  ;;  %v1731_v42 = vadd.f32 %v4184_v25, %v4080_v61 }
 0x1f4   : > { %v3239_v52 = vpop.eup %3238  ;;  %v2221_v28 = vmul.f32 %v3237_v43, %v4086_v32  ;;  %3256 = vrcp.f32 %v2130_v8  ;;  %v1971_v32 = vmul.f32 %v3978_v53, %v1733_v2  ;;  %v1898_v11 = vadd.f32 %v4186_v21, %v4156_v49 }
 0x1f5   : > { %v3241_v18 = vpop.eup %3240  ;;  %v2219_v7 = vmul.f32 %v3239_v52, %v4091_v20  ;;  %3258 = vpow2.f32 %v2696_v27  ;;  %v2699_v20 = vmul.f32 -1.442695, %v4213_v41  ;;  %v2706_v38 = vmul.f32 -1.442695, %v4228_v15 }
 0x1f6   : > { %v3243_v60 = vpop.eup %3242  ;;  %v2222_v47 = vmul.f32 %v3241_v18, %v4096_v26  ;;  %3260 = vpow2.f32 %v2701_v54  ;;  %v4225_v26 = vadd.f32 %v3986_v23, %v1971_v32  ;;  %v1969_v59 = vmul.f32 %v3978_v53, %v1731_v42 }
 0x1f7   : > { %v3245_v24 = vpop.eup %3244  ;;  %v2220_v16 = vmul.f32 %v3243_v60, %v4100_v33  ;;  %3262 = vpow2.f32 %v2705_v44  ;;  %v2703_v33 = vmul.f32 -1.442695, %v4222_v10  ;;  %v1973_v12 = vmul.f32 %v3978_v53, %v1898_v11 }
 0x1f8   : > { %v3247_v36 = vpop.eup %3246  ;;  %v2817_v55 = vpack.c.bf16 %v2222_v47, %v2221_v28  ;;  %v2128_v56 = vadd.f32 1.0, %v3245_v24  ;;  %3264 = vpow2.f32 %v2699_v20  ;;  %v2702_v34 = vmul.f32 -1.442695, %v4225_v26 }
 0x1f9   : > { %v3249_v13 = vpop.eup %3248  ;;  %v2812_v57 = vpack.c.bf16 %v2220_v16, %v2219_v7  ;;  %v2133_v58 = vadd.f32 1.0, %v3247_v36  ;;  %v4244_v49 = vadd.f32 %v3986_v23, %v1969_v59  ;;  %v4247_v21 = vadd.f32 %v3986_v23, %v1973_v12 }
 0x1fa   : > { %2865 = vst [vmem:[%s4128_s27 + $0x38] sm:$0xff] %v2817_v55   ;;  %3266 = vrcp.f32 %v2128_v56  ;;  %v2131_v51 = vadd.f32 1.0, %v3249_v13  ;;  %v3251_v40 = vpop.eup %3250 }
 0x1fb   : > { %2864 = vst [vmem:[%s4128_s27 + $0x30] sm:$0xff] %v2812_v57   ;;  %3268 = vrcp.f32 %v2133_v58  ;;  %v2134_v30 = vadd.f32 1.0, %v3251_v40  ;;  %v2700_v46 = vmul.f32 -1.442695, %v4244_v49 }
 0x1fc   : > { %v3253_v4 = vpop.eup %3252  ;;  %3270 = vrcp.f32 %v2131_v51 }
 0x1fd   : > { %v3255_v27 = vpop.eup %3254  ;;  %3272 = vpow2.f32 %v2703_v33  ;;  %v2225_v17 = vmul.f32 %v3253_v4, %v4124_v63 }
 0x1fe   : > { %v3257_v45 = vpop.eup %3256  ;;  %3274 = vrcp.f32 %v2134_v30  ;;  %v2223_v43 = vmul.f32 %v3255_v27, %v4132_v22 }
 0x1ff   : > { %v3259_v61 = vpop.eup %3258  ;;  %v2226_v25 = vmul.f32 %v3257_v45, %v4138_v39  ;;  %3276 = vpow2.f32 %v2702_v34  ;;  %v2704_v39 = vmul.f32 -1.442695, %v4247_v21 }
 0x200   : > { %v3261_v0 = vpop.eup %3260  ;;  %v2132_v9 = vadd.f32 1.0, %v3259_v61  ;;  %3278 = vpow2.f32 %v2706_v38 }
 0x201   : > { %v3263_v48 = vpop.eup %3262  ;;  %v2827_v53 = vpack.c.bf16 %v2226_v25, %v2225_v17  ;;  %v2137_v3 = vadd.f32 1.0, %v3261_v0 }
 0x202   : > { %3280 = vrcp.f32 %v2132_v9  ;;  %v3265_v63 = vpop.eup %3264  ;;  %v2141_v28 = vadd.f32 1.0, %v3263_v48 }
 0x203   : > { %2867 = vst [vmem:[%s4128_s27 + $0x48] sm:$0xff] %v2827_v53   ;;  %3282 = vpow2.f32 %v2700_v46  ;;  %v2135_v32 = vadd.f32 1.0, %v3265_v63 }
 0x204   : > { %v3267_v8 = vpop.eup %3266  ;;  %3284 = vpow2.f32 %v2704_v39 }
 0x205   : > { %v3269_v54 = vpop.eup %3268  ;;  %v2224_v23 = vmul.f32 %v3267_v8, %v4150_v5  ;;  %3286 = vrcp.f32 %v2137_v3 }
 0x206   : > { %v3271_v29 = vpop.eup %3270  ;;  %v2229_v18 = vmul.f32 %v3269_v54, %v4166_v19  ;;  %3288 = vrcp.f32 %v2141_v28 }
 0x207   : > { %v3273_v2 = vpop.eup %3272  ;;  %v2822_v52 = vpack.c.bf16 %v2224_v23, %v2223_v43  ;;  %v2227_v62 = vmul.f32 %v3271_v29, %v4169_v6 }
 0x208   : > { %v3275_v44 = vpop.eup %3274  ;;  %v2139_v16 = vadd.f32 1.0, %v3273_v2 }
 0x209   : > { %v3277_v31 = vpop.eup %3276  ;;  %2866 = vst [vmem:[%s4128_s27 + $0x40] sm:$0xff] %v2822_v52   ;;  %v2230_v7 = vmul.f32 %v3275_v44, %v4179_v1 }
 0x20a   : > { %v3279_v14 = vpop.eup %3278  ;;  %v2138_v22 = vadd.f32 1.0, %v3277_v31 }
 0x20b   : > { %v2837_v60 = vpack.c.bf16 %v2230_v7, %v2229_v18  ;;  %v2142_v5 = vadd.f32 1.0, %v3279_v14 }
 0x20c   : > { %v3281_v47 = vpop.eup %3280  ;;  %3290 = vrcp.f32 %v2138_v22 }
 0x20d   : > { %2869 = vst [vmem:[%s4128_s27 + $0x58] sm:$0xff] %v2837_v60   ;;  %v2228_v24 = vmul.f32 %v3281_v47, %v4182_v35  ;;  %3292 = vrcp.f32 %v2142_v5  ;;  %v3283_v19 = vpop.eup %3282 }
 0x20e   : > { %3294 = vrcp.f32 %v2135_v32  ;;  %v2136_v1 = vadd.f32 1.0, %v3283_v19  ;;  %v3285_v36 = vpop.eup %3284 }
 0x20f   : > { %v2832_v20 = vpack.c.bf16 %v2228_v24, %v2227_v62  ;;  %3296 = vrcp.f32 %v2139_v16  ;;  %v2140_v55 = vadd.f32 1.0, %v3285_v36  ;;  %v3287_v56 = vpop.eup %3286 }
 0x210   : > { %3298 = vrcp.f32 %v2136_v1  ;;  %v3289_v13 = vpop.eup %3288  ;;  %v2233_v35 = vmul.f32 %v3287_v56, %v4195_v37 }
 0x211   : > { %2868 = vst [vmem:[%s4128_s27 + $0x50] sm:$0xff] %v2832_v20   ;;  %3300 = vrcp.f32 %v2140_v55  ;;  %v2237_v33 = vmul.f32 %v3289_v13, %v4202_v50 }
 0x216   : > { %v3291_v6 = vpop.eup %3290 }
 0x217   : > { %v3293_v57 = vpop.eup %3292  ;;  %v2234_v58 = vmul.f32 %v3291_v6, %v4225_v26 }
 0x218   : > { %v2238_v51 = vmul.f32 %v3293_v57, %v4228_v15  ;;  %v3295_v34 = vpop.eup %3294 }
 0x219   : > { %v2847_v40 = vpack.c.bf16 %v2234_v58, %v2233_v35  ;;  %v3297_v11 = vpop.eup %3296  ;;  %v2231_v30 = vmul.f32 %v3295_v34, %v4213_v41 }
 0x21a   : > { %v2857_v42 = vpack.c.bf16 %v2238_v51, %v2237_v33  ;;  %v3299_v4 = vpop.eup %3298  ;;  %v2235_v50 = vmul.f32 %v3297_v11, %v4222_v10 }
 0x21b   : > { %2871 = vst [vmem:[%s4128_s27 + $0x68] sm:$0xff] %v2847_v40   ;;  %v2232_v37 = vmul.f32 %v3299_v4, %v4244_v49  ;;  %v3301_v26 = vpop.eup %3300 }
 0x21c   : > { %2873 = vst [vmem:[%s4128_s27 + $0x78] sm:$0xff] %v2857_v42   ;;  %v2236_v38 = vmul.f32 %v3301_v26, %v4247_v21 }
 0x21d   : > { %v2842_v15 = vpack.c.bf16 %v2232_v37, %v2231_v30 }
 0x21e   : > { %v2852_v27 = vpack.c.bf16 %v2236_v38, %v2235_v50 }
 0x21f   : > { %2870 = vst [vmem:[%s4128_s27 + $0x60] sm:$0xff] %v2842_v15  }
 0x220   : > { %2872 = vst [vmem:[%s4128_s27 + $0x70] sm:$0xff] %v2852_v27  }
 0x221   : > { %3315 = shalt.err (!%p3312_p5)
}
 0x222   : > { %s3316_s15 = scalar_lea.hbm %s4276_s10, 2048  ;;  %s3320_s25 = scalar_lea.hbm %s4336_s5, 4096 }
 0x223   : > { %p3317_p6 = scmp.ne.s32.totalorder %s4276_s10, %s3316_s15  ;;  %p3321_p10 = scmp.lt.u32.totalorder %s4276_s10, %s4336_s5 }
 0x224   : > { %p3322_p11 = scmp.lt.u32.totalorder %s3320_s25, %s3316_s15  ;;  %p3324_p13 = scmp.lt.u32.totalorder %s3316_s15, %s4276_s10 }
 0x225   : > { %p3318_p7 = pnand %p3317_p6, %p3458_p4 }
 0x226   : > { %p3323_p12 = por %p3322_p11, %p3321_p10 }
 0x227   : > { %p3319_p9 = pneg %p3318_p7 }
 0x228   : > { %p3325_p0 = por %p3324_p13, %p3323_p12 }
 0x22a   : > { %p3326_p1 = pnand %p3325_p0, %p3319_p9 }
 0x22c   : > { %3329 = shalt.err (!%p3326_p1)
}
 0x22d   : > { %s3387_s8 = smov 64  }
 0x22e   : > { %3070 = dma.vmem_to_hbm [thread:$0]  (%p3458_p4), %s4279_s7, 2048, %s4276_s10, %s4284_s21, %s3387_s8, %s3387_s8, %s3384_s17  }
 0x22f PF: > { %p3077_p2 = scmp.ge.s32.totalorder %s3380_s23, 2  ;;  %s2432_s9 = sand.u32 1, %s3360_s18  }
 0x230   : > { %s2433_s11 = scalar_lea.sflag [#allocation4], %s2432_s9 }
 0x231   : > { %p3073_p3 = pnand %p3077_p2, %p3465_p8 }
 0x233   : > { %3355 = dma.done.wait (!%p3073_p3), %s2433_s11, 2048  }
 0x234   : > { %3357 = vsyncadd (!%p3073_p3), %s2433_s11, 4294965248  ;;  %s18_s23 = sadd.s32 1, %s3380_s23   ;;  %s4339_s18 = smov %s3364_s19 }
 0x235   : > { %p15_p5 = scmp.ge.s32.totalorder %s18_s23, 4   ;;  %s4340_s19 = smov %s3368_s20 }
 0x236   : > { %s4341_s20 = smov %s3471_s6  ;;  %s4342_s21 = smov %s3376_s22 }
 0x237   : > { %s4343_s22 = smov %s4345_s26  ;;  %17 = sbr.rel (!%p15_p5) target bundleno = 4 (0x4), region = 89 }
 0x23e   :  { %2438 = vsyncpa [#allocation4], 1 }
 0x23f   :  { %2440 = vsyncpa [#allocation4 + $0x1], 1 }

</bundles_post_ra>
